<compile_context>
chip_gen: v6e
topology: v6e:2x2x1
jax: 0.10.0
libtpu: 0.0.40
codegen_flags: <defaults>
</compile_context>

<pallas_src>
import jax
import jax.numpy as jnp
from jax.experimental import pallas as pl
from jax.experimental.pallas import tpu as pltpu

LANES = 128            # lane-dense last dim (multiple of 128 -> unmasked vst)
_SUBLANE_MULT = 32     # row-tile granularity: clean sublane packing for f32/bf16/int8
_SMALL_TOTAL = 262144  # below this, XLA fusion beats standalone pallas_call overhead


def _subtract_kernel(x_ref, y_ref, o_ref):
    # Elementwise subtract on the current VMEM tile (VPU). Any dtype widening
    # happens on-chip here rather than as a wrapper-side astype.
    o_ref[...] = x_ref[...].astype(o_ref.dtype) - y_ref[...].astype(o_ref.dtype)


def _block_byte_budget() -> int:
    """Per-operand block byte budget, chosen by TPU generation.

    Pipeline footprint is ~ 3 operands x 2 buffers x budget; keep it inside the
    scoped-VMEM default of each generation (v5e 16 MiB, v6e 32 MiB, v7x 32 MiB).
    """
    try:
        kind = jax.devices()[0].device_kind.lower()
    except Exception:  # pragma: no cover - defensive, e.g. no devices yet
        kind = ""
    if "v7" in kind:
        return 4 * 1024 * 1024   # 24 MiB pipeline; HBM ~3.2 TB/s needs big steps
    if "v6" in kind:
        return 2 * 1024 * 1024   # 12 MiB pipeline; at/above the measured knee
    return 1 * 1024 * 1024       # v5e / unknown: 6 MiB pipeline, ~9% step overhead


def _round_up(v: int, m: int) -> int:
    return ((v + m - 1) // m) * m


def subtract(x: jax.Array, y: jax.Array) -> jax.Array:
    """Elementwise x - y (PyTorch `Subtract.forward`) as a Pallas TPU kernel."""
    out_dtype = jnp.result_type(x.dtype, y.dtype)

    # Broadcasting: keep correctness via plain XLA instead of materializing a
    # full broadcast_to copy in HBM before a bandwidth-bound kernel.
    # TODO(synk): in-kernel broadcast (index_map reusing the same block) for
    # bias-like operands if that path ever becomes hot.
    if x.shape != y.shape:
        return (x - y).astype(out_dtype)

    out_shape = x.shape
    total = 1
    for d in out_shape:
        total *= d

    # Tiny tensors: plain XLA (fusable into surrounding graph) is strictly
    # faster than a standalone pallas_call custom call.
    if total < _SMALL_TOTAL:
        return (x - y).astype(out_dtype)

    # Non-128-divisible totals: the previous pad path roughly doubled HBM
    # traffic (jnp.pad copies + output slice), which dominates a pure
    # bandwidth-bound op. Plain XLA is the better choice there.
    if total % LANES != 0:
        return (x - y).astype(out_dtype)

    # Lane-dense 2D view. total % 128 == 0 -> pure metadata reshape, zero copies.
    n_rows = total // LANES

    # Block sizing: bytes-per-block budget / itemsize (dtype-aware), rounded to
    # a multiple of 32 rows, and clamped so the grid has >= 2 steps (keeps the
    # "parallel" axis usable by v7x's second TensorCore).
    max_itemsize = max(
        jnp.dtype(x.dtype).itemsize,
        jnp.dtype(y.dtype).itemsize,
        jnp.dtype(out_dtype).itemsize,
    )
    budget = _block_byte_budget()
    target_rows = max(_SUBLANE_MULT, (budget // (LANES * max_itemsize)))
    target_rows = _round_up(target_rows, _SUBLANE_MULT)
    half_rows = _round_up(pl.cdiv(n_rows, 2), _SUBLANE_MULT)
    row_tile = max(_SUBLANE_MULT, min(target_rows, half_rows))

    grid = (pl.cdiv(n_rows, row_tile),)
    spec = pl.BlockSpec((row_tile, LANES), lambda i: (i, 0))

    x2 = x.reshape(n_rows, LANES)
    y2 = y.reshape(n_rows, LANES)

    bytes_accessed = total * (
        jnp.dtype(x.dtype).itemsize
        + jnp.dtype(y.dtype).itemsize
        + jnp.dtype(out_dtype).itemsize
    )

    out2d = pl.pallas_call(
        _subtract_kernel,
        out_shape=jax.ShapeDtypeStruct((n_rows, LANES), out_dtype),
        grid_spec=pltpu.PrefetchScalarGridSpec(
            num_scalar_prefetch=0,
            grid=grid,
            in_specs=[spec, spec],
            out_specs=spec,
        ),
        compiler_params=pltpu.CompilerParams(
            dimension_semantics=("parallel",),
        ),
        cost_estimate=pl.CostEstimate(
            flops=total, transcendentals=0, bytes_accessed=bytes_accessed
        ),
    )(x2, y2)

    return out2d.reshape(out_shape)


if __name__ == "__main__":
    k0, k1, k2, k3 = jax.random.split(jax.random.PRNGKey(0), 4)

    # Small DnCNN-like NCHW shape: routed through the plain-XLA short-circuit.
    xs = jax.random.normal(k0, (2, 4, 16, 16), dtype=jnp.float32)
    ys = jax.random.normal(k1, (2, 4, 16, 16), dtype=jnp.float32)
    out_s = subtract(xs, ys)
    jax.block_until_ready(out_s)
    ref_s = xs - ys
    assert out_s.shape == ref_s.shape and out_s.dtype == ref_s.dtype
    assert jnp.array_equal(out_s, ref_s)

    # Larger NCHW shape: exercises the Pallas kernel path (zero-copy reshape,
    # 2*4*256*256 = 512K elements -> 4096 lane-dense rows -> >= 2 grid steps).
    xl = jax.random.normal(k2, (2, 4, 256, 256), dtype=jnp.float32)
    yl = jax.random.normal(k3, (2, 4, 256, 256), dtype=jnp.float32)
    out_l = subtract(xl, yl)
    jax.block_until_ready(out_l)
    ref_l = xl - yl
    assert out_l.shape == ref_l.shape and out_l.dtype == ref_l.dtype
    assert jnp.array_equal(out_l, ref_l)

    # Mixed-dtype path: widening happens inside the kernel on the VPU.
    xb = xl.astype(jnp.bfloat16)
    out_m = subtract(xb, yl)
    jax.block_until_ready(out_m)
    ref_m = xb.astype(jnp.float32) - yl
    assert out_m.shape == ref_m.shape and out_m.dtype == ref_m.dtype
    assert jnp.allclose(out_m, ref_m)

    print("KERNEL_OK")
</pallas_src>

<mosaic_0001>
module attributes {stable_mosaic.version = 11 : i64} {
  func.func @_subtract_kernel(%arg0: i32, %arg1: memref<2048x128xf32, #tpu.memory_space<vmem>>, %arg2: memref<2048x128xf32, #tpu.memory_space<vmem>>, %arg3: memref<2048x128xf32, #tpu.memory_space<vmem>>) attributes {dimension_semantics = [#tpu.dimension_semantics<parallel>], iteration_bounds = array<i64: 2>, scalar_prefetch = 0 : i64, scratch_operands = 0 : i64, tpu.core_type = #tpu.core_type<tc>, window_params = [{transform_indices = @transform_0, window_bounds = array<i64: 2048, 128>}, {transform_indices = @transform_1, window_bounds = array<i64: 2048, 128>}, {transform_indices = @transform_2, window_bounds = array<i64: 2048, 128>}]} {
    %c0 = arith.constant 0 : index
    %c0_0 = arith.constant 0 : index
    %0 = vector.load %arg1[%c0, %c0_0] : memref<2048x128xf32, #tpu.memory_space<vmem>>, vector<2048x128xf32>
    %c0_1 = arith.constant 0 : index
    %c0_2 = arith.constant 0 : index
    %1 = vector.load %arg2[%c0_1, %c0_2] : memref<2048x128xf32, #tpu.memory_space<vmem>>, vector<2048x128xf32>
    %2 = arith.subf %0, %1 : vector<2048x128xf32>
    %c0_3 = arith.constant 0 : index
    %c0_4 = arith.constant 0 : index
    %3 = vector.load %arg3[%c0_3, %c0_4] : memref<2048x128xf32, #tpu.memory_space<vmem>>, vector<2048x128xf32>
    tpu.vector_store %arg3[%c0_3, %c0_4], %2 {strides = array<i32>} : memref<2048x128xf32, #tpu.memory_space<vmem>>, vector<2048x128xf32>,
    return
  }
  func.func @transform_0(%arg0: i32) -> (i32, i32) {
    %c0_i32 = arith.constant 0 : i32
    %c0_i32_0 = arith.constant 0 : i32
    return %arg0, %c0_i32 : i32, i32
  }
  func.func @transform_1(%arg0: i32) -> (i32, i32) {
    %c0_i32 = arith.constant 0 : i32
    %c0_i32_0 = arith.constant 0 : i32
    return %arg0, %c0_i32 : i32, i32
  }
  func.func @transform_2(%arg0: i32) -> (i32, i32) {
    %c0_i32 = arith.constant 0 : i32
    %c0_i32_0 = arith.constant 0 : i32
    return %arg0, %c0_i32 : i32, i32
  }
}

</mosaic_0001>

<bundles_post_ra>
// kernel: tpu_custom_call.1
= control target key start
LH: loop header
LB: loop body
LE: loop exit
PB: predicated region body
PF: predicated region fallthrough
CT: control target
= control target key end

     0   :  { %7 = vsyncpa [#allocation3], 0  ;;  %s2556_s0 = inlined_call_operand.hbm [shape: f32[4096,128], index: 0, kind: input, shape index: {}]   ;;  %s2557_s1 = inlined_call_operand.hbm [shape: f32[4096,128], index: 1, kind: input, shape index: {}]   ;;  %s2558_s2 = inlined_call_operand.hbm [shape: f32[4096,128], index: 2, kind: output, shape index: {}]  }
   0x1   :  { %9 = vsyncpa [#allocation3 + $0x1], 0 }
   0x2   :  { %10 = vsyncpa [#allocation6], 0 }
   0x3   :  { %12 = vsyncpa [#allocation6 + $0x1], 0 }
   0x4   :  { %13 = vsyncpa [#allocation4], 0 }
   0x5   :  { %15 = vsyncpa [#allocation4 + $0x1], 0  ;;  %s1563_s9 = smov 0   ;;  %s1565_s10 = smov 0  }
   0x6   :  { %s1567_s11 = smov 0   ;;  %s1569_s12 = smov 0  }
   0x7 LB: > { %s1584_s13 = sadd.s32 4294967295, %s1539_s12   ;;  %s1339_s14 = sadd.s32 4294967294, %s1539_s12   ;;  %s1539_s12 = sphi %s1569_s12, %s2574_s12   ;;  %s1535_s11 = sphi %s1567_s11, %s2573_s11   ;;  %s1531_s10 = sphi %s1565_s10, %s2572_s10   ;;  %s1527_s9 = sphi %s1563_s9, %s2571_s9  }
   0x8   : > { %s1588_s15 = sadd.s32 1, %s1539_s12   ;;  %s28_s16 = sadd.s32 1, %s1535_s11 }
   0x9   : > { %s25_s17 = ssub.s32 %s1539_s12, %s1588_s15  ;;  %p35_p0 = scmp.ne.s32.totalorder %s1535_s11, %s1531_s10 }
   0xa   : > { %p26_p1 = scmp.eq.s32.totalorder %s25_s17, 0  ;;  %p36_p2 = scmp.eq.s32.totalorder %s1539_s12, 0 }
   0xb   : > { %p41_p3 = scmp.ne.s32.totalorder %s1531_s10, %s1527_s9  ;;  %p42_p4 = scmp.eq.s32.totalorder %s1584_s13, 0 }
   0xc   : > { %s1600_s18 = scalar_select %p26_p1, %s1535_s11, %s28_s16  }
   0xd   : > { %p1602_p5 = por %p36_p2, %p35_p0  ;;  %p1606_p6 = por %p42_p4, %p41_p3 }
   0xe   : > { %p91_p7 = scmp.eq.s32.totalorder %s1584_s13, 1  ;;  %p97_p8 = scmp.eq.s32.totalorder %s1339_s14, 1 }
   0xf   : > { %s2562_s20 = scalar_select %p1606_p6, 1, 0 }
  0x10   : > { %p1377_p10 = scmp.lt.s32.totalorder %s1539_s12, 2  ;;  %p1613_p11 = por %p91_p7, %p35_p0 }
  0x11   : > { %p1617_p12 = por %p97_p8, %p41_p3  ;;  %s1622_s23 = sand.u32 1, %s1535_s11  }
  0x12   : > { %s2563_s21 = scalar_select %p1613_p11, 1, 0 }
  0x13   : > { %s2564_s22 = scalar_select %p1617_p12, 1, 0 }
  0x14   : > { %s1357_s24 = sshll.u32 %s1539_s12, 15  ;;  %s1342_s25 = sshll.u32 %s1622_s23, 11 }
  0x15   : > { %s1631_s28 = scalar_lea.hbm %s2556_s0, %s1357_s24  ;;  %s121_s29 = scalar_lea.vmem [#allocation2], %s1342_s25 }
  0x16   : > { %s128_s30 = sshll.u32 %s121_s29, 4  ;;  %p1637_p13 = pnand %p1377_p10, %p1602_p5  ;;  %s1641_s30 = int_to_ptr.vmem [resolvable:$true] %s128_s30 }
  0x17   : > { %s118_s4 = scalar_lea.sflag [#allocation3], %s1622_s23  ;;  %s1415_s5 = scalar_lea.hbm %s1631_s28, 32768 }
  0x18   : > { %p1416_p0 = scmp.ne.s32.totalorder %s1631_s28, %s1415_s5  ;;  %p1417_p1 = pneg %p1637_p13 }
  0x19   : > { %s1420_s8 = scalar_lea.hbm %s2556_s0, 65536  ;;  %p1421_p4 = scmp.lt.s32.totalorder %s1631_s28, %s2556_s0 }
  0x1a   : > { %p1418_p2 = pnand %p1417_p1, %p1416_p0  ;;  %p1422_p5 = scmp.lt.s32.totalorder %s1420_s8, %s1415_s5 }
  0x1c   : > { %p1419_p3 = pneg %p1418_p2  ;;  %p1423_p7 = por %p1422_p5, %p1421_p4 }
  0x1e   : > { %p1424_p8 = pnand %p1423_p7, %p1419_p3 }
  0x20   : > { %1427 = shalt.err (!%p1424_p8)
}
  0x21   : > { %s1428_s17 = scalar_lea.vmem %s1641_s30, 32768  ;;  %s1541_s19 = smov [#allocation2]  }
  0x22   : > { %p1429_p10 = scmp.ne.s32.totalorder %s1641_s30, %s1428_s17  ;;  %s1433_s26 = sshll.u32 %s1541_s19, 4  ;;  %s1434_s26 = int_to_ptr.vmem [resolvable:$false] %s1433_s26 }
  0x23   : > { %s1435_s27 = scalar_lea.vmem %s1434_s26, 65536  ;;  %p1436_p9 = scmp.lt.s32.totalorder %s1641_s30, %s1434_s26 }
  0x24   : > { %p1431_p0 = pnand %p1429_p10, %p1417_p1  ;;  %p1437_p12 = scmp.lt.s32.totalorder %s1435_s27, %s1428_s17 }
  0x26   : > { %p1432_p2 = pneg %p1431_p0  ;;  %p1438_p11 = por %p1437_p12, %p1436_p9 }
  0x28   : > { %p1439_p4 = pnand %p1438_p11, %p1432_p2 }
  0x2a   : > { %1442 = shalt.err (!%p1439_p4)
}
  0x2b   : > { %s1542_s29 = smov 128   ;;  %s1543_s5 = smov 8  }
  0x2c   : > { %1369 = dma.hbm_to_vmem [thread:$0]  (!%p1637_p13), %s1631_s28, 32768, %s1641_s30, %s118_s4, %s1542_s29, %s1542_s29, %s1543_s5  }
  0x2d   : > { %p1348_p9 = scmp.ge.s32.totalorder %s1539_s12, 1  ;;  %p157_p11 = scmp.lt.s32.totalorder %s1539_s12, 3 }
  0x2e   : > { %s1684_s14 = scalar_lea.hbm %s2557_s1, %s1357_s24  ;;  %s142_s16 = scalar_lea.vmem [#allocation5], %s1342_s25 }
  0x2f   : > { %p1675_p12 = pnand %p1348_p9, %p157_p11  ;;  %s149_s17 = sshll.u32 %s142_s16, 4  ;;  %s1688_s17 = int_to_ptr.vmem [resolvable:$true] %s149_s17 }
  0x30   : > { %s139_s28 = scalar_lea.sflag [#allocation6], %s1622_s23  ;;  %s1443_s30 = scalar_lea.hbm %s1684_s14, 32768 }
  0x31   : > { %p1444_p3 = scmp.ne.s32.totalorder %s1684_s14, %s1443_s30  ;;  %s1448_s24 = scalar_lea.hbm %s2557_s1, 65536 }
  0x32   : > { %p1449_p8 = scmp.lt.s32.totalorder %s1684_s14, %s2557_s1  ;;  %p1450_p10 = scmp.lt.s32.totalorder %s1448_s24, %s1443_s30 }
  0x33   : > { %p1446_p5 = pnand %p1444_p3, %p1417_p1 }
  0x34   : > { %p1451_p0 = por %p1450_p10, %p1449_p8 }
  0x35   : > { %p1447_p7 = pneg %p1446_p5 }
  0x37   : > { %p1452_p2 = pnand %p1451_p0, %p1447_p7 }
  0x39   : > { %1455 = shalt.err (!%p1452_p2)
}
  0x3a   : > { %s1456_s23 = scalar_lea.vmem %s1688_s17, 32768  ;;  %s1544_s25 = smov [#allocation5]  }
  0x3b   : > { %p1457_p4 = scmp.ne.s32.totalorder %s1688_s17, %s1456_s23  ;;  %s1461_s7 = sshll.u32 %s1544_s25, 4  ;;  %s1462_s7 = int_to_ptr.vmem [resolvable:$false] %s1461_s7 }
  0x3c   : > { %s1463_s8 = scalar_lea.vmem %s1462_s7, 65536  ;;  %p1464_p3 = scmp.lt.s32.totalorder %s1688_s17, %s1462_s7 }
  0x3d   : > { %p1459_p9 = pnand %p1457_p4, %p1417_p1  ;;  %p1465_p5 = scmp.lt.s32.totalorder %s1463_s8, %s1456_s23 }
  0x3f   : > { %p1460_p11 = pneg %p1459_p9  ;;  %p1466_p6 = por %p1465_p5, %p1464_p3 }
  0x41   : > { %p1467_p8 = pnand %p1466_p6, %p1460_p11 }
  0x43   : > { %1470 = shalt.err (!%p1467_p8)
}
  0x44   : > { %1372 = dma.hbm_to_vmem [thread:$0]  (!%p1637_p13), %s1684_s14, 32768, %s1688_s17, %s139_s28, %s1542_s29, %s1542_s29, %s1543_s5  }
  0x45   : > { %161 = sbr.rel (%p1675_p12) target bundleno = 293 (0x125), region = 28  ;;  %s1719_s16 = sand.u32 (!%p1675_p12), 1, %s1531_s10  }
  0x46   : > { %s1349_s30 = sshll.u32 (!%p1675_p12), %s1719_s16, 11  ;;  %s164_s4 = scalar_lea.sflag (!%p1675_p12), [#allocation3], %s1719_s16 }
  0x47   : > { %s1723_s19 = scalar_lea.vmem (!%p1675_p12), [#allocation2], %s1349_s30  ;;  %p2567_p6 = scmp.ne.s32.totalorder (!%p1675_p12), %s2562_s20, 0 }
  0x4a   : > { %1514 = dma.done.wait (%p2567_p6), %s164_s4, 32768  }
  0x4b   : > { %1516 = vsyncadd (%p2567_p6), %s164_s4, 4294934528  ;;  %s173_s3 = scalar_lea.sflag [#allocation6], %s1719_s16  ;;  %s1730_s29 = scalar_lea.vmem [#allocation5], %s1349_s30 }
  0x4c   : > { %1518 = dma.done.wait (%p2567_p6), %s173_s3, 32768  }
  0x4d   : > { %1520 = vsyncadd (%p2567_p6), %s173_s3, 4294934528  ;;  %v205_v0 = vld [vmem:[%s1723_s19] sm:$0xff]  ;;  %v206_v2 = vld [vmem:[%s1723_s19 + $0x8] sm:$0xff]  ;;  %s1745_s20 = scalar_lea.vmem [#allocation7], %s1349_s30  ;;  %s1359_s5 = sshll.u32 %s1584_s13, 15 }
  0x4e   : > { %v461_v1 = vld [vmem:[%s1730_s29] sm:$0xff]  ;;  %v462_v4 = vld [vmem:[%s1730_s29 + $0x8] sm:$0xff]  ;;  %v207_v5 = vld [vmem:[%s1723_s19 + $0x10] sm:$0xff]  ;;  %s1243_s6 = sshll.u32 %s1745_s20, 4  ;;  %s2507_s17 = scalar_lea.hbm %s2558_s2, %s1359_s5  ;;  %s2509_s6 = int_to_ptr.vmem [resolvable:$true] %s1243_s6 }
  0x4f   : > { %v717_v3 = vsub.f32 %v205_v0, %v461_v1  ;;  %v463_v6 = vld [vmem:[%s1730_s29 + $0x10] sm:$0xff]  ;;  %v718_v7 = vsub.f32 %v206_v2, %v462_v4  ;;  %v208_v9 = vld [vmem:[%s1723_s19 + $0x18] sm:$0xff]  ;;  %v209_v11 = vld [vmem:[%s1723_s19 + $0x20] sm:$0xff]  ;;  %s1230_s28 = scalar_lea.sflag [#allocation4], %s1719_s16  ;;  %s1471_s24 = scalar_lea.vmem %s2509_s6, 32768 }
  0x50   : > { %v719_v8 = vsub.f32 %v207_v5, %v463_v6  ;;  %v464_v10 = vld [vmem:[%s1730_s29 + $0x18] sm:$0xff]  ;;  %v465_v13 = vld [vmem:[%s1730_s29 + $0x20] sm:$0xff]  ;;  %v210_v14 = vld [vmem:[%s1723_s19 + $0x28] sm:$0xff]  ;;  %p1472_p13 = scmp.ne.s32.totalorder %s2509_s6, %s1471_s24  ;;  %p2568_p1 = scmp.ne.s32.totalorder %s2563_s21, 0 }
  0x51   : > { %973 = vst [vmem:[%s1745_s20] sm:$0xff] %v717_v3  ;;  %v720_v12 = vsub.f32 %v208_v9, %v464_v10  ;;  %v466_v15 = vld [vmem:[%s1730_s29 + $0x28] sm:$0xff]  ;;  %974 = vst [vmem:[%s1745_s20 + $0x8] sm:$0xff] %v718_v7  ;;  %v721_v16 = vsub.f32 %v209_v11, %v465_v13  ;;  %v211_v18 = vld [vmem:[%s1723_s19 + $0x30] sm:$0xff]  ;;  %s1545_s26 = smov [#allocation7]  }
  0x52   : > { %975 = vst [vmem:[%s1745_s20 + $0x10] sm:$0xff] %v719_v8  ;;  %v722_v17 = vsub.f32 %v210_v14, %v466_v15  ;;  %v467_v19 = vld [vmem:[%s1730_s29 + $0x30] sm:$0xff]  ;;  %v212_v20 = vld [vmem:[%s1723_s19 + $0x38] sm:$0xff]  ;;  %v213_v23 = vld [vmem:[%s1723_s19 + $0x40] sm:$0xff]  ;;  %p1473_p12 = pnand %p1472_p13, %p2568_p1  ;;  %s1475_s27 = sshll.u32 %s1545_s26, 4  ;;  %s1476_s27 = int_to_ptr.vmem [resolvable:$false] %s1475_s27 }
  0x53   : > { %976 = vst [vmem:[%s1745_s20 + $0x18] sm:$0xff] %v720_v12  ;;  %v723_v21 = vsub.f32 %v211_v18, %v467_v19  ;;  %v468_v22 = vld [vmem:[%s1730_s29 + $0x38] sm:$0xff]  ;;  %v469_v24 = vld [vmem:[%s1730_s29 + $0x40] sm:$0xff]  ;;  %977 = vst [vmem:[%s1745_s20 + $0x20] sm:$0xff] %v721_v16  ;;  %s1477_s23 = scalar_lea.vmem %s1476_s27, 65536  ;;  %p1478_p10 = scmp.lt.s32.totalorder %s2509_s6, %s1476_s27 }
  0x54   : > { %978 = vst [vmem:[%s1745_s20 + $0x28] sm:$0xff] %v722_v17  ;;  %v724_v25 = vsub.f32 %v212_v20, %v468_v22  ;;  %v725_v26 = vsub.f32 %v213_v23, %v469_v24  ;;  %v214_v27 = vld [vmem:[%s1723_s19 + $0x48] sm:$0xff]  ;;  %v215_v29 = vld [vmem:[%s1723_s19 + $0x50] sm:$0xff]  ;;  %v216_v32 = vld [vmem:[%s1723_s19 + $0x58] sm:$0xff]  ;;  %p1474_p7 = pneg %p1473_p12  ;;  %p1479_p0 = scmp.lt.s32.totalorder %s1477_s23, %s1471_s24 }
  0x55   : > { %v470_v28 = vld [vmem:[%s1730_s29 + $0x48] sm:$0xff]  ;;  %979 = vst [vmem:[%s1745_s20 + $0x30] sm:$0xff] %v723_v21  ;;  %v471_v31 = vld [vmem:[%s1730_s29 + $0x50] sm:$0xff]  ;;  %v472_v33 = vld [vmem:[%s1730_s29 + $0x58] sm:$0xff] }
  0x56   : > { %v726_v30 = vsub.f32 %v214_v27, %v470_v28  ;;  %980 = vst [vmem:[%s1745_s20 + $0x38] sm:$0xff] %v724_v25  ;;  %981 = vst [vmem:[%s1745_s20 + $0x40] sm:$0xff] %v725_v26  ;;  %v727_v34 = vsub.f32 %v215_v29, %v471_v31  ;;  %v728_v35 = vsub.f32 %v216_v32, %v472_v33  ;;  %v217_v36 = vld [vmem:[%s1723_s19 + $0x60] sm:$0xff]  ;;  %v218_v38 = vld [vmem:[%s1723_s19 + $0x68] sm:$0xff]  ;;  %p1480_p2 = por %p1479_p0, %p1478_p10 }
  0x57   : > { %v473_v37 = vld [vmem:[%s1730_s29 + $0x60] sm:$0xff]  ;;  %v474_v40 = vld [vmem:[%s1730_s29 + $0x68] sm:$0xff]  ;;  %v219_v41 = vld [vmem:[%s1723_s19 + $0x70] sm:$0xff] }
  0x58   : > { %982 = vst [vmem:[%s1745_s20 + $0x48] sm:$0xff] %v726_v30  ;;  %v729_v39 = vsub.f32 %v217_v36, %v473_v37  ;;  %v475_v42 = vld [vmem:[%s1730_s29 + $0x70] sm:$0xff]  ;;  %983 = vst [vmem:[%s1745_s20 + $0x50] sm:$0xff] %v727_v34  ;;  %v730_v43 = vsub.f32 %v218_v38, %v474_v40  ;;  %v220_v45 = vld [vmem:[%s1723_s19 + $0x78] sm:$0xff]  ;;  %p1481_p4 = pnand %p1480_p2, %p1474_p7 }
  0x59   : > { %984 = vst [vmem:[%s1745_s20 + $0x58] sm:$0xff] %v728_v35  ;;  %v731_v44 = vsub.f32 %v219_v41, %v475_v42  ;;  %v476_v46 = vld [vmem:[%s1730_s29 + $0x78] sm:$0xff]  ;;  %v221_v47 = vld [vmem:[%s1723_s19 + $0x80] sm:$0xff]  ;;  %v222_v50 = vld [vmem:[%s1723_s19 + $0x88] sm:$0xff] }
  0x5a   : > { %985 = vst [vmem:[%s1745_s20 + $0x60] sm:$0xff] %v729_v39  ;;  %v732_v48 = vsub.f32 %v220_v45, %v476_v46  ;;  %v477_v49 = vld [vmem:[%s1730_s29 + $0x80] sm:$0xff]  ;;  %v478_v51 = vld [vmem:[%s1730_s29 + $0x88] sm:$0xff]  ;;  %986 = vst [vmem:[%s1745_s20 + $0x68] sm:$0xff] %v730_v43 }
  0x5b   : > { %987 = vst [vmem:[%s1745_s20 + $0x70] sm:$0xff] %v731_v44  ;;  %v733_v52 = vsub.f32 %v221_v47, %v477_v49  ;;  %v734_v53 = vsub.f32 %v222_v50, %v478_v51  ;;  %v223_v54 = vld [vmem:[%s1723_s19 + $0x90] sm:$0xff]  ;;  %v224_v56 = vld [vmem:[%s1723_s19 + $0x98] sm:$0xff]  ;;  %v225_v59 = vld [vmem:[%s1723_s19 + $0xa0] sm:$0xff] }
  0x5c   : > { %v479_v55 = vld [vmem:[%s1730_s29 + $0x90] sm:$0xff]  ;;  %988 = vst [vmem:[%s1745_s20 + $0x78] sm:$0xff] %v732_v48  ;;  %v480_v58 = vld [vmem:[%s1730_s29 + $0x98] sm:$0xff]  ;;  %v481_v60 = vld [vmem:[%s1730_s29 + $0xa0] sm:$0xff] }
  0x5d   : > { %v735_v57 = vsub.f32 %v223_v54, %v479_v55  ;;  %989 = vst [vmem:[%s1745_s20 + $0x80] sm:$0xff] %v733_v52  ;;  %990 = vst [vmem:[%s1745_s20 + $0x88] sm:$0xff] %v734_v53  ;;  %v736_v61 = vsub.f32 %v224_v56, %v480_v58  ;;  %v737_v62 = vsub.f32 %v225_v59, %v481_v60  ;;  %v226_v63 = vld [vmem:[%s1723_s19 + $0xa8] sm:$0xff]  ;;  %v227_v1 = vld [vmem:[%s1723_s19 + $0xb0] sm:$0xff] }
  0x5e   : > { %v482_v0 = vld [vmem:[%s1730_s29 + $0xa8] sm:$0xff]  ;;  %v483_v3 = vld [vmem:[%s1730_s29 + $0xb0] sm:$0xff]  ;;  %v228_v4 = vld [vmem:[%s1723_s19 + $0xb8] sm:$0xff] }
  0x5f   : > { %991 = vst [vmem:[%s1745_s20 + $0x90] sm:$0xff] %v735_v57  ;;  %v738_v2 = vsub.f32 %v226_v63, %v482_v0  ;;  %v484_v5 = vld [vmem:[%s1730_s29 + $0xb8] sm:$0xff]  ;;  %992 = vst [vmem:[%s1745_s20 + $0x98] sm:$0xff] %v736_v61  ;;  %v739_v6 = vsub.f32 %v227_v1, %v483_v3  ;;  %v229_v8 = vld [vmem:[%s1723_s19 + $0xc0] sm:$0xff] }
  0x60   : > { %993 = vst [vmem:[%s1745_s20 + $0xa0] sm:$0xff] %v737_v62  ;;  %v740_v7 = vsub.f32 %v228_v4, %v484_v5  ;;  %v485_v9 = vld [vmem:[%s1730_s29 + $0xc0] sm:$0xff]  ;;  %v230_v10 = vld [vmem:[%s1723_s19 + $0xc8] sm:$0xff]  ;;  %v231_v13 = vld [vmem:[%s1723_s19 + $0xd0] sm:$0xff] }
  0x61   : > { %994 = vst [vmem:[%s1745_s20 + $0xa8] sm:$0xff] %v738_v2  ;;  %v741_v11 = vsub.f32 %v229_v8, %v485_v9  ;;  %v486_v12 = vld [vmem:[%s1730_s29 + $0xc8] sm:$0xff]  ;;  %v487_v14 = vld [vmem:[%s1730_s29 + $0xd0] sm:$0xff]  ;;  %995 = vst [vmem:[%s1745_s20 + $0xb0] sm:$0xff] %v739_v6 }
  0x62   : > { %996 = vst [vmem:[%s1745_s20 + $0xb8] sm:$0xff] %v740_v7  ;;  %v742_v15 = vsub.f32 %v230_v10, %v486_v12  ;;  %v743_v16 = vsub.f32 %v231_v13, %v487_v14  ;;  %v232_v17 = vld [vmem:[%s1723_s19 + $0xd8] sm:$0xff]  ;;  %v233_v19 = vld [vmem:[%s1723_s19 + $0xe0] sm:$0xff]  ;;  %v234_v22 = vld [vmem:[%s1723_s19 + $0xe8] sm:$0xff] }
  0x63   : > { %v488_v18 = vld [vmem:[%s1730_s29 + $0xd8] sm:$0xff]  ;;  %997 = vst [vmem:[%s1745_s20 + $0xc0] sm:$0xff] %v741_v11  ;;  %v489_v21 = vld [vmem:[%s1730_s29 + $0xe0] sm:$0xff]  ;;  %v490_v23 = vld [vmem:[%s1730_s29 + $0xe8] sm:$0xff] }
  0x64   : > { %v744_v20 = vsub.f32 %v232_v17, %v488_v18  ;;  %998 = vst [vmem:[%s1745_s20 + $0xc8] sm:$0xff] %v742_v15  ;;  %999 = vst [vmem:[%s1745_s20 + $0xd0] sm:$0xff] %v743_v16  ;;  %v745_v24 = vsub.f32 %v233_v19, %v489_v21  ;;  %v746_v25 = vsub.f32 %v234_v22, %v490_v23  ;;  %v235_v26 = vld [vmem:[%s1723_s19 + $0xf0] sm:$0xff]  ;;  %v236_v28 = vld [vmem:[%s1723_s19 + $0xf8] sm:$0xff] }
  0x65   : > { %v491_v27 = vld [vmem:[%s1730_s29 + $0xf0] sm:$0xff]  ;;  %v492_v30 = vld [vmem:[%s1730_s29 + $0xf8] sm:$0xff]  ;;  %v237_v31 = vld [vmem:[%s1723_s19 + $0x100] sm:$0xff] }
  0x66   : > { %1000 = vst [vmem:[%s1745_s20 + $0xd8] sm:$0xff] %v744_v20  ;;  %v747_v29 = vsub.f32 %v235_v26, %v491_v27  ;;  %v493_v32 = vld [vmem:[%s1730_s29 + $0x100] sm:$0xff]  ;;  %1001 = vst [vmem:[%s1745_s20 + $0xe0] sm:$0xff] %v745_v24  ;;  %v748_v33 = vsub.f32 %v236_v28, %v492_v30  ;;  %v238_v35 = vld [vmem:[%s1723_s19 + $0x108] sm:$0xff] }
  0x67   : > { %1002 = vst [vmem:[%s1745_s20 + $0xe8] sm:$0xff] %v746_v25  ;;  %v749_v34 = vsub.f32 %v237_v31, %v493_v32  ;;  %v494_v36 = vld [vmem:[%s1730_s29 + $0x108] sm:$0xff]  ;;  %v239_v37 = vld [vmem:[%s1723_s19 + $0x110] sm:$0xff]  ;;  %v240_v40 = vld [vmem:[%s1723_s19 + $0x118] sm:$0xff] }
  0x68   : > { %1003 = vst [vmem:[%s1745_s20 + $0xf0] sm:$0xff] %v747_v29  ;;  %v750_v38 = vsub.f32 %v238_v35, %v494_v36  ;;  %v495_v39 = vld [vmem:[%s1730_s29 + $0x110] sm:$0xff]  ;;  %v496_v41 = vld [vmem:[%s1730_s29 + $0x118] sm:$0xff]  ;;  %1004 = vst [vmem:[%s1745_s20 + $0xf8] sm:$0xff] %v748_v33 }
  0x69   : > { %1005 = vst [vmem:[%s1745_s20 + $0x100] sm:$0xff] %v749_v34  ;;  %v751_v42 = vsub.f32 %v239_v37, %v495_v39  ;;  %v752_v43 = vsub.f32 %v240_v40, %v496_v41  ;;  %v241_v44 = vld [vmem:[%s1723_s19 + $0x120] sm:$0xff]  ;;  %v242_v46 = vld [vmem:[%s1723_s19 + $0x128] sm:$0xff]  ;;  %v243_v49 = vld [vmem:[%s1723_s19 + $0x130] sm:$0xff] }
  0x6a   : > { %v497_v45 = vld [vmem:[%s1730_s29 + $0x120] sm:$0xff]  ;;  %1006 = vst [vmem:[%s1745_s20 + $0x108] sm:$0xff] %v750_v38  ;;  %v498_v48 = vld [vmem:[%s1730_s29 + $0x128] sm:$0xff]  ;;  %v499_v50 = vld [vmem:[%s1730_s29 + $0x130] sm:$0xff] }
  0x6b   : > { %v753_v47 = vsub.f32 %v241_v44, %v497_v45  ;;  %1007 = vst [vmem:[%s1745_s20 + $0x110] sm:$0xff] %v751_v42  ;;  %1008 = vst [vmem:[%s1745_s20 + $0x118] sm:$0xff] %v752_v43  ;;  %v754_v51 = vsub.f32 %v242_v46, %v498_v48  ;;  %v755_v52 = vsub.f32 %v243_v49, %v499_v50  ;;  %v244_v53 = vld [vmem:[%s1723_s19 + $0x138] sm:$0xff]  ;;  %v245_v55 = vld [vmem:[%s1723_s19 + $0x140] sm:$0xff] }
  0x6c   : > { %v500_v54 = vld [vmem:[%s1730_s29 + $0x138] sm:$0xff]  ;;  %v501_v57 = vld [vmem:[%s1730_s29 + $0x140] sm:$0xff]  ;;  %v246_v58 = vld [vmem:[%s1723_s19 + $0x148] sm:$0xff] }
  0x6d   : > { %1009 = vst [vmem:[%s1745_s20 + $0x120] sm:$0xff] %v753_v47  ;;  %v756_v56 = vsub.f32 %v244_v53, %v500_v54  ;;  %v502_v59 = vld [vmem:[%s1730_s29 + $0x148] sm:$0xff]  ;;  %1010 = vst [vmem:[%s1745_s20 + $0x128] sm:$0xff] %v754_v51  ;;  %v757_v60 = vsub.f32 %v245_v55, %v501_v57  ;;  %v247_v62 = vld [vmem:[%s1723_s19 + $0x150] sm:$0xff] }
  0x6e   : > { %1011 = vst [vmem:[%s1745_s20 + $0x130] sm:$0xff] %v755_v52  ;;  %v758_v61 = vsub.f32 %v246_v58, %v502_v59  ;;  %v503_v63 = vld [vmem:[%s1730_s29 + $0x150] sm:$0xff]  ;;  %v248_v0 = vld [vmem:[%s1723_s19 + $0x158] sm:$0xff]  ;;  %v249_v3 = vld [vmem:[%s1723_s19 + $0x160] sm:$0xff] }
  0x6f   : > { %1012 = vst [vmem:[%s1745_s20 + $0x138] sm:$0xff] %v756_v56  ;;  %v759_v1 = vsub.f32 %v247_v62, %v503_v63  ;;  %v504_v2 = vld [vmem:[%s1730_s29 + $0x158] sm:$0xff]  ;;  %v505_v4 = vld [vmem:[%s1730_s29 + $0x160] sm:$0xff]  ;;  %1013 = vst [vmem:[%s1745_s20 + $0x140] sm:$0xff] %v757_v60 }
  0x70   : > { %1014 = vst [vmem:[%s1745_s20 + $0x148] sm:$0xff] %v758_v61  ;;  %v760_v5 = vsub.f32 %v248_v0, %v504_v2  ;;  %v761_v6 = vsub.f32 %v249_v3, %v505_v4  ;;  %v250_v7 = vld [vmem:[%s1723_s19 + $0x168] sm:$0xff]  ;;  %v251_v9 = vld [vmem:[%s1723_s19 + $0x170] sm:$0xff]  ;;  %v252_v12 = vld [vmem:[%s1723_s19 + $0x178] sm:$0xff] }
  0x71   : > { %v506_v8 = vld [vmem:[%s1730_s29 + $0x168] sm:$0xff]  ;;  %1015 = vst [vmem:[%s1745_s20 + $0x150] sm:$0xff] %v759_v1  ;;  %v507_v11 = vld [vmem:[%s1730_s29 + $0x170] sm:$0xff]  ;;  %v508_v13 = vld [vmem:[%s1730_s29 + $0x178] sm:$0xff] }
  0x72   : > { %v762_v10 = vsub.f32 %v250_v7, %v506_v8  ;;  %1016 = vst [vmem:[%s1745_s20 + $0x158] sm:$0xff] %v760_v5  ;;  %1017 = vst [vmem:[%s1745_s20 + $0x160] sm:$0xff] %v761_v6  ;;  %v763_v14 = vsub.f32 %v251_v9, %v507_v11  ;;  %v764_v15 = vsub.f32 %v252_v12, %v508_v13  ;;  %v253_v16 = vld [vmem:[%s1723_s19 + $0x180] sm:$0xff]  ;;  %v254_v18 = vld [vmem:[%s1723_s19 + $0x188] sm:$0xff] }
  0x73   : > { %v509_v17 = vld [vmem:[%s1730_s29 + $0x180] sm:$0xff]  ;;  %v510_v20 = vld [vmem:[%s1730_s29 + $0x188] sm:$0xff]  ;;  %v255_v21 = vld [vmem:[%s1723_s19 + $0x190] sm:$0xff] }
  0x74   : > { %1018 = vst [vmem:[%s1745_s20 + $0x168] sm:$0xff] %v762_v10  ;;  %v765_v19 = vsub.f32 %v253_v16, %v509_v17  ;;  %v511_v22 = vld [vmem:[%s1730_s29 + $0x190] sm:$0xff]  ;;  %1019 = vst [vmem:[%s1745_s20 + $0x170] sm:$0xff] %v763_v14  ;;  %v766_v23 = vsub.f32 %v254_v18, %v510_v20  ;;  %v256_v25 = vld [vmem:[%s1723_s19 + $0x198] sm:$0xff] }
  0x75   : > { %1020 = vst [vmem:[%s1745_s20 + $0x178] sm:$0xff] %v764_v15  ;;  %v767_v24 = vsub.f32 %v255_v21, %v511_v22  ;;  %v512_v26 = vld [vmem:[%s1730_s29 + $0x198] sm:$0xff]  ;;  %v257_v27 = vld [vmem:[%s1723_s19 + $0x1a0] sm:$0xff]  ;;  %v258_v30 = vld [vmem:[%s1723_s19 + $0x1a8] sm:$0xff] }
  0x76   : > { %1021 = vst [vmem:[%s1745_s20 + $0x180] sm:$0xff] %v765_v19  ;;  %v768_v28 = vsub.f32 %v256_v25, %v512_v26  ;;  %v513_v29 = vld [vmem:[%s1730_s29 + $0x1a0] sm:$0xff]  ;;  %v514_v31 = vld [vmem:[%s1730_s29 + $0x1a8] sm:$0xff]  ;;  %1022 = vst [vmem:[%s1745_s20 + $0x188] sm:$0xff] %v766_v23 }
  0x77   : > { %1023 = vst [vmem:[%s1745_s20 + $0x190] sm:$0xff] %v767_v24  ;;  %v769_v32 = vsub.f32 %v257_v27, %v513_v29  ;;  %v770_v33 = vsub.f32 %v258_v30, %v514_v31  ;;  %v259_v34 = vld [vmem:[%s1723_s19 + $0x1b0] sm:$0xff]  ;;  %v260_v36 = vld [vmem:[%s1723_s19 + $0x1b8] sm:$0xff]  ;;  %v261_v39 = vld [vmem:[%s1723_s19 + $0x1c0] sm:$0xff] }
  0x78   : > { %v515_v35 = vld [vmem:[%s1730_s29 + $0x1b0] sm:$0xff]  ;;  %1024 = vst [vmem:[%s1745_s20 + $0x198] sm:$0xff] %v768_v28  ;;  %v516_v38 = vld [vmem:[%s1730_s29 + $0x1b8] sm:$0xff]  ;;  %v517_v40 = vld [vmem:[%s1730_s29 + $0x1c0] sm:$0xff] }
  0x79   : > { %v771_v37 = vsub.f32 %v259_v34, %v515_v35  ;;  %1025 = vst [vmem:[%s1745_s20 + $0x1a0] sm:$0xff] %v769_v32  ;;  %1026 = vst [vmem:[%s1745_s20 + $0x1a8] sm:$0xff] %v770_v33  ;;  %v772_v41 = vsub.f32 %v260_v36, %v516_v38  ;;  %v773_v42 = vsub.f32 %v261_v39, %v517_v40  ;;  %v262_v43 = vld [vmem:[%s1723_s19 + $0x1c8] sm:$0xff]  ;;  %v263_v45 = vld [vmem:[%s1723_s19 + $0x1d0] sm:$0xff] }
  0x7a   : > { %v518_v44 = vld [vmem:[%s1730_s29 + $0x1c8] sm:$0xff]  ;;  %v519_v47 = vld [vmem:[%s1730_s29 + $0x1d0] sm:$0xff]  ;;  %v264_v48 = vld [vmem:[%s1723_s19 + $0x1d8] sm:$0xff] }
  0x7b   : > { %1027 = vst [vmem:[%s1745_s20 + $0x1b0] sm:$0xff] %v771_v37  ;;  %v774_v46 = vsub.f32 %v262_v43, %v518_v44  ;;  %v520_v49 = vld [vmem:[%s1730_s29 + $0x1d8] sm:$0xff]  ;;  %1028 = vst [vmem:[%s1745_s20 + $0x1b8] sm:$0xff] %v772_v41  ;;  %v775_v50 = vsub.f32 %v263_v45, %v519_v47  ;;  %v265_v52 = vld [vmem:[%s1723_s19 + $0x1e0] sm:$0xff] }
  0x7c   : > { %1029 = vst [vmem:[%s1745_s20 + $0x1c0] sm:$0xff] %v773_v42  ;;  %v776_v51 = vsub.f32 %v264_v48, %v520_v49  ;;  %v521_v53 = vld [vmem:[%s1730_s29 + $0x1e0] sm:$0xff]  ;;  %v266_v54 = vld [vmem:[%s1723_s19 + $0x1e8] sm:$0xff]  ;;  %v267_v57 = vld [vmem:[%s1723_s19 + $0x1f0] sm:$0xff] }
  0x7d   : > { %1030 = vst [vmem:[%s1745_s20 + $0x1c8] sm:$0xff] %v774_v46  ;;  %v777_v55 = vsub.f32 %v265_v52, %v521_v53  ;;  %v522_v56 = vld [vmem:[%s1730_s29 + $0x1e8] sm:$0xff]  ;;  %v523_v58 = vld [vmem:[%s1730_s29 + $0x1f0] sm:$0xff]  ;;  %1031 = vst [vmem:[%s1745_s20 + $0x1d0] sm:$0xff] %v775_v50 }
  0x7e   : > { %1032 = vst [vmem:[%s1745_s20 + $0x1d8] sm:$0xff] %v776_v51  ;;  %v778_v59 = vsub.f32 %v266_v54, %v522_v56  ;;  %v779_v60 = vsub.f32 %v267_v57, %v523_v58  ;;  %v268_v61 = vld [vmem:[%s1723_s19 + $0x1f8] sm:$0xff]  ;;  %v269_v63 = vld [vmem:[%s1723_s19 + $0x200] sm:$0xff]  ;;  %v270_v2 = vld [vmem:[%s1723_s19 + $0x208] sm:$0xff] }
  0x7f   : > { %v524_v62 = vld [vmem:[%s1730_s29 + $0x1f8] sm:$0xff]  ;;  %1033 = vst [vmem:[%s1745_s20 + $0x1e0] sm:$0xff] %v777_v55  ;;  %v525_v1 = vld [vmem:[%s1730_s29 + $0x200] sm:$0xff]  ;;  %v526_v3 = vld [vmem:[%s1730_s29 + $0x208] sm:$0xff] }
  0x80   : > { %v780_v0 = vsub.f32 %v268_v61, %v524_v62  ;;  %1034 = vst [vmem:[%s1745_s20 + $0x1e8] sm:$0xff] %v778_v59  ;;  %1035 = vst [vmem:[%s1745_s20 + $0x1f0] sm:$0xff] %v779_v60  ;;  %v781_v4 = vsub.f32 %v269_v63, %v525_v1  ;;  %v782_v5 = vsub.f32 %v270_v2, %v526_v3  ;;  %v271_v6 = vld [vmem:[%s1723_s19 + $0x210] sm:$0xff]  ;;  %v272_v8 = vld [vmem:[%s1723_s19 + $0x218] sm:$0xff] }
  0x81   : > { %v527_v7 = vld [vmem:[%s1730_s29 + $0x210] sm:$0xff]  ;;  %v528_v10 = vld [vmem:[%s1730_s29 + $0x218] sm:$0xff]  ;;  %v273_v11 = vld [vmem:[%s1723_s19 + $0x220] sm:$0xff] }
  0x82   : > { %1036 = vst [vmem:[%s1745_s20 + $0x1f8] sm:$0xff] %v780_v0  ;;  %v783_v9 = vsub.f32 %v271_v6, %v527_v7  ;;  %v529_v12 = vld [vmem:[%s1730_s29 + $0x220] sm:$0xff]  ;;  %1037 = vst [vmem:[%s1745_s20 + $0x200] sm:$0xff] %v781_v4  ;;  %v784_v13 = vsub.f32 %v272_v8, %v528_v10  ;;  %v274_v15 = vld [vmem:[%s1723_s19 + $0x228] sm:$0xff] }
  0x83   : > { %1038 = vst [vmem:[%s1745_s20 + $0x208] sm:$0xff] %v782_v5  ;;  %v785_v14 = vsub.f32 %v273_v11, %v529_v12  ;;  %v530_v16 = vld [vmem:[%s1730_s29 + $0x228] sm:$0xff]  ;;  %v275_v17 = vld [vmem:[%s1723_s19 + $0x230] sm:$0xff]  ;;  %v276_v20 = vld [vmem:[%s1723_s19 + $0x238] sm:$0xff] }
  0x84   : > { %1039 = vst [vmem:[%s1745_s20 + $0x210] sm:$0xff] %v783_v9  ;;  %v786_v18 = vsub.f32 %v274_v15, %v530_v16  ;;  %v531_v19 = vld [vmem:[%s1730_s29 + $0x230] sm:$0xff]  ;;  %v532_v21 = vld [vmem:[%s1730_s29 + $0x238] sm:$0xff]  ;;  %1040 = vst [vmem:[%s1745_s20 + $0x218] sm:$0xff] %v784_v13 }
  0x85   : > { %1041 = vst [vmem:[%s1745_s20 + $0x220] sm:$0xff] %v785_v14  ;;  %v787_v22 = vsub.f32 %v275_v17, %v531_v19  ;;  %v788_v23 = vsub.f32 %v276_v20, %v532_v21  ;;  %v277_v24 = vld [vmem:[%s1723_s19 + $0x240] sm:$0xff]  ;;  %v278_v26 = vld [vmem:[%s1723_s19 + $0x248] sm:$0xff]  ;;  %v279_v29 = vld [vmem:[%s1723_s19 + $0x250] sm:$0xff] }
  0x86   : > { %v533_v25 = vld [vmem:[%s1730_s29 + $0x240] sm:$0xff]  ;;  %1042 = vst [vmem:[%s1745_s20 + $0x228] sm:$0xff] %v786_v18  ;;  %v534_v28 = vld [vmem:[%s1730_s29 + $0x248] sm:$0xff]  ;;  %v535_v30 = vld [vmem:[%s1730_s29 + $0x250] sm:$0xff] }
  0x87   : > { %v789_v27 = vsub.f32 %v277_v24, %v533_v25  ;;  %1043 = vst [vmem:[%s1745_s20 + $0x230] sm:$0xff] %v787_v22  ;;  %1044 = vst [vmem:[%s1745_s20 + $0x238] sm:$0xff] %v788_v23  ;;  %v790_v31 = vsub.f32 %v278_v26, %v534_v28  ;;  %v791_v32 = vsub.f32 %v279_v29, %v535_v30  ;;  %v280_v33 = vld [vmem:[%s1723_s19 + $0x258] sm:$0xff]  ;;  %v281_v35 = vld [vmem:[%s1723_s19 + $0x260] sm:$0xff] }
  0x88   : > { %v536_v34 = vld [vmem:[%s1730_s29 + $0x258] sm:$0xff]  ;;  %v537_v37 = vld [vmem:[%s1730_s29 + $0x260] sm:$0xff]  ;;  %v282_v38 = vld [vmem:[%s1723_s19 + $0x268] sm:$0xff] }
  0x89   : > { %1045 = vst [vmem:[%s1745_s20 + $0x240] sm:$0xff] %v789_v27  ;;  %v792_v36 = vsub.f32 %v280_v33, %v536_v34  ;;  %v538_v39 = vld [vmem:[%s1730_s29 + $0x268] sm:$0xff]  ;;  %1046 = vst [vmem:[%s1745_s20 + $0x248] sm:$0xff] %v790_v31  ;;  %v793_v40 = vsub.f32 %v281_v35, %v537_v37  ;;  %v283_v42 = vld [vmem:[%s1723_s19 + $0x270] sm:$0xff] }
  0x8a   : > { %1047 = vst [vmem:[%s1745_s20 + $0x250] sm:$0xff] %v791_v32  ;;  %v794_v41 = vsub.f32 %v282_v38, %v538_v39  ;;  %v539_v43 = vld [vmem:[%s1730_s29 + $0x270] sm:$0xff]  ;;  %v284_v44 = vld [vmem:[%s1723_s19 + $0x278] sm:$0xff]  ;;  %v285_v47 = vld [vmem:[%s1723_s19 + $0x280] sm:$0xff] }
  0x8b   : > { %1048 = vst [vmem:[%s1745_s20 + $0x258] sm:$0xff] %v792_v36  ;;  %v795_v45 = vsub.f32 %v283_v42, %v539_v43  ;;  %v540_v46 = vld [vmem:[%s1730_s29 + $0x278] sm:$0xff]  ;;  %v541_v48 = vld [vmem:[%s1730_s29 + $0x280] sm:$0xff]  ;;  %1049 = vst [vmem:[%s1745_s20 + $0x260] sm:$0xff] %v793_v40 }
  0x8c   : > { %1050 = vst [vmem:[%s1745_s20 + $0x268] sm:$0xff] %v794_v41  ;;  %v796_v49 = vsub.f32 %v284_v44, %v540_v46  ;;  %v797_v50 = vsub.f32 %v285_v47, %v541_v48  ;;  %v286_v51 = vld [vmem:[%s1723_s19 + $0x288] sm:$0xff]  ;;  %v287_v53 = vld [vmem:[%s1723_s19 + $0x290] sm:$0xff]  ;;  %v288_v56 = vld [vmem:[%s1723_s19 + $0x298] sm:$0xff] }
  0x8d   : > { %v542_v52 = vld [vmem:[%s1730_s29 + $0x288] sm:$0xff]  ;;  %1051 = vst [vmem:[%s1745_s20 + $0x270] sm:$0xff] %v795_v45  ;;  %v543_v55 = vld [vmem:[%s1730_s29 + $0x290] sm:$0xff]  ;;  %v544_v57 = vld [vmem:[%s1730_s29 + $0x298] sm:$0xff] }
  0x8e   : > { %v798_v54 = vsub.f32 %v286_v51, %v542_v52  ;;  %1052 = vst [vmem:[%s1745_s20 + $0x278] sm:$0xff] %v796_v49  ;;  %1053 = vst [vmem:[%s1745_s20 + $0x280] sm:$0xff] %v797_v50  ;;  %v799_v58 = vsub.f32 %v287_v53, %v543_v55  ;;  %v800_v59 = vsub.f32 %v288_v56, %v544_v57  ;;  %v289_v60 = vld [vmem:[%s1723_s19 + $0x2a0] sm:$0xff]  ;;  %v290_v62 = vld [vmem:[%s1723_s19 + $0x2a8] sm:$0xff] }
  0x8f   : > { %v545_v61 = vld [vmem:[%s1730_s29 + $0x2a0] sm:$0xff]  ;;  %v546_v0 = vld [vmem:[%s1730_s29 + $0x2a8] sm:$0xff]  ;;  %v291_v1 = vld [vmem:[%s1723_s19 + $0x2b0] sm:$0xff] }
  0x90   : > { %1054 = vst [vmem:[%s1745_s20 + $0x288] sm:$0xff] %v798_v54  ;;  %v801_v63 = vsub.f32 %v289_v60, %v545_v61  ;;  %v547_v2 = vld [vmem:[%s1730_s29 + $0x2b0] sm:$0xff]  ;;  %1055 = vst [vmem:[%s1745_s20 + $0x290] sm:$0xff] %v799_v58  ;;  %v802_v3 = vsub.f32 %v290_v62, %v546_v0  ;;  %v292_v5 = vld [vmem:[%s1723_s19 + $0x2b8] sm:$0xff] }
  0x91   : > { %1056 = vst [vmem:[%s1745_s20 + $0x298] sm:$0xff] %v800_v59  ;;  %v803_v4 = vsub.f32 %v291_v1, %v547_v2  ;;  %v548_v6 = vld [vmem:[%s1730_s29 + $0x2b8] sm:$0xff]  ;;  %v293_v7 = vld [vmem:[%s1723_s19 + $0x2c0] sm:$0xff]  ;;  %v294_v10 = vld [vmem:[%s1723_s19 + $0x2c8] sm:$0xff] }
  0x92   : > { %1057 = vst [vmem:[%s1745_s20 + $0x2a0] sm:$0xff] %v801_v63  ;;  %v804_v8 = vsub.f32 %v292_v5, %v548_v6  ;;  %v549_v9 = vld [vmem:[%s1730_s29 + $0x2c0] sm:$0xff]  ;;  %v550_v11 = vld [vmem:[%s1730_s29 + $0x2c8] sm:$0xff]  ;;  %1058 = vst [vmem:[%s1745_s20 + $0x2a8] sm:$0xff] %v802_v3 }
  0x93   : > { %1059 = vst [vmem:[%s1745_s20 + $0x2b0] sm:$0xff] %v803_v4  ;;  %v805_v12 = vsub.f32 %v293_v7, %v549_v9  ;;  %v806_v13 = vsub.f32 %v294_v10, %v550_v11  ;;  %v295_v14 = vld [vmem:[%s1723_s19 + $0x2d0] sm:$0xff]  ;;  %v296_v16 = vld [vmem:[%s1723_s19 + $0x2d8] sm:$0xff]  ;;  %v297_v19 = vld [vmem:[%s1723_s19 + $0x2e0] sm:$0xff] }
  0x94   : > { %v551_v15 = vld [vmem:[%s1730_s29 + $0x2d0] sm:$0xff]  ;;  %1060 = vst [vmem:[%s1745_s20 + $0x2b8] sm:$0xff] %v804_v8  ;;  %v552_v18 = vld [vmem:[%s1730_s29 + $0x2d8] sm:$0xff]  ;;  %v553_v20 = vld [vmem:[%s1730_s29 + $0x2e0] sm:$0xff] }
  0x95   : > { %v807_v17 = vsub.f32 %v295_v14, %v551_v15  ;;  %1061 = vst [vmem:[%s1745_s20 + $0x2c0] sm:$0xff] %v805_v12  ;;  %1062 = vst [vmem:[%s1745_s20 + $0x2c8] sm:$0xff] %v806_v13  ;;  %v808_v21 = vsub.f32 %v296_v16, %v552_v18  ;;  %v809_v22 = vsub.f32 %v297_v19, %v553_v20  ;;  %v298_v23 = vld [vmem:[%s1723_s19 + $0x2e8] sm:$0xff]  ;;  %v299_v25 = vld [vmem:[%s1723_s19 + $0x2f0] sm:$0xff] }
  0x96   : > { %v554_v24 = vld [vmem:[%s1730_s29 + $0x2e8] sm:$0xff]  ;;  %v555_v27 = vld [vmem:[%s1730_s29 + $0x2f0] sm:$0xff]  ;;  %v300_v28 = vld [vmem:[%s1723_s19 + $0x2f8] sm:$0xff] }
  0x97   : > { %1063 = vst [vmem:[%s1745_s20 + $0x2d0] sm:$0xff] %v807_v17  ;;  %v810_v26 = vsub.f32 %v298_v23, %v554_v24  ;;  %v556_v29 = vld [vmem:[%s1730_s29 + $0x2f8] sm:$0xff]  ;;  %1064 = vst [vmem:[%s1745_s20 + $0x2d8] sm:$0xff] %v808_v21  ;;  %v811_v30 = vsub.f32 %v299_v25, %v555_v27  ;;  %v301_v32 = vld [vmem:[%s1723_s19 + $0x300] sm:$0xff] }
  0x98   : > { %1065 = vst [vmem:[%s1745_s20 + $0x2e0] sm:$0xff] %v809_v22  ;;  %v812_v31 = vsub.f32 %v300_v28, %v556_v29  ;;  %v557_v33 = vld [vmem:[%s1730_s29 + $0x300] sm:$0xff]  ;;  %v302_v34 = vld [vmem:[%s1723_s19 + $0x308] sm:$0xff]  ;;  %v303_v37 = vld [vmem:[%s1723_s19 + $0x310] sm:$0xff] }
  0x99   : > { %1066 = vst [vmem:[%s1745_s20 + $0x2e8] sm:$0xff] %v810_v26  ;;  %v813_v35 = vsub.f32 %v301_v32, %v557_v33  ;;  %v558_v36 = vld [vmem:[%s1730_s29 + $0x308] sm:$0xff]  ;;  %v559_v38 = vld [vmem:[%s1730_s29 + $0x310] sm:$0xff]  ;;  %1067 = vst [vmem:[%s1745_s20 + $0x2f0] sm:$0xff] %v811_v30 }
  0x9a   : > { %1068 = vst [vmem:[%s1745_s20 + $0x2f8] sm:$0xff] %v812_v31  ;;  %v814_v39 = vsub.f32 %v302_v34, %v558_v36  ;;  %v815_v40 = vsub.f32 %v303_v37, %v559_v38  ;;  %v304_v41 = vld [vmem:[%s1723_s19 + $0x318] sm:$0xff]  ;;  %v305_v43 = vld [vmem:[%s1723_s19 + $0x320] sm:$0xff]  ;;  %v306_v46 = vld [vmem:[%s1723_s19 + $0x328] sm:$0xff] }
  0x9b   : > { %v560_v42 = vld [vmem:[%s1730_s29 + $0x318] sm:$0xff]  ;;  %1069 = vst [vmem:[%s1745_s20 + $0x300] sm:$0xff] %v813_v35  ;;  %v561_v45 = vld [vmem:[%s1730_s29 + $0x320] sm:$0xff]  ;;  %v562_v47 = vld [vmem:[%s1730_s29 + $0x328] sm:$0xff] }
  0x9c   : > { %v816_v44 = vsub.f32 %v304_v41, %v560_v42  ;;  %1070 = vst [vmem:[%s1745_s20 + $0x308] sm:$0xff] %v814_v39  ;;  %1071 = vst [vmem:[%s1745_s20 + $0x310] sm:$0xff] %v815_v40  ;;  %v817_v48 = vsub.f32 %v305_v43, %v561_v45  ;;  %v818_v49 = vsub.f32 %v306_v46, %v562_v47  ;;  %v307_v50 = vld [vmem:[%s1723_s19 + $0x330] sm:$0xff]  ;;  %v308_v52 = vld [vmem:[%s1723_s19 + $0x338] sm:$0xff] }
  0x9d   : > { %v563_v51 = vld [vmem:[%s1730_s29 + $0x330] sm:$0xff]  ;;  %v564_v54 = vld [vmem:[%s1730_s29 + $0x338] sm:$0xff]  ;;  %v309_v55 = vld [vmem:[%s1723_s19 + $0x340] sm:$0xff] }
  0x9e   : > { %1072 = vst [vmem:[%s1745_s20 + $0x318] sm:$0xff] %v816_v44  ;;  %v819_v53 = vsub.f32 %v307_v50, %v563_v51  ;;  %v565_v56 = vld [vmem:[%s1730_s29 + $0x340] sm:$0xff]  ;;  %1073 = vst [vmem:[%s1745_s20 + $0x320] sm:$0xff] %v817_v48  ;;  %v820_v57 = vsub.f32 %v308_v52, %v564_v54  ;;  %v310_v59 = vld [vmem:[%s1723_s19 + $0x348] sm:$0xff] }
  0x9f   : > { %1074 = vst [vmem:[%s1745_s20 + $0x328] sm:$0xff] %v818_v49  ;;  %v821_v58 = vsub.f32 %v309_v55, %v565_v56  ;;  %v566_v60 = vld [vmem:[%s1730_s29 + $0x348] sm:$0xff]  ;;  %v311_v61 = vld [vmem:[%s1723_s19 + $0x350] sm:$0xff]  ;;  %v312_v0 = vld [vmem:[%s1723_s19 + $0x358] sm:$0xff] }
  0xa0   : > { %1075 = vst [vmem:[%s1745_s20 + $0x330] sm:$0xff] %v819_v53  ;;  %v822_v62 = vsub.f32 %v310_v59, %v566_v60  ;;  %v567_v63 = vld [vmem:[%s1730_s29 + $0x350] sm:$0xff]  ;;  %v568_v1 = vld [vmem:[%s1730_s29 + $0x358] sm:$0xff]  ;;  %1076 = vst [vmem:[%s1745_s20 + $0x338] sm:$0xff] %v820_v57 }
  0xa1   : > { %1077 = vst [vmem:[%s1745_s20 + $0x340] sm:$0xff] %v821_v58  ;;  %v823_v2 = vsub.f32 %v311_v61, %v567_v63  ;;  %v824_v3 = vsub.f32 %v312_v0, %v568_v1  ;;  %v313_v4 = vld [vmem:[%s1723_s19 + $0x360] sm:$0xff]  ;;  %v314_v6 = vld [vmem:[%s1723_s19 + $0x368] sm:$0xff]  ;;  %v315_v9 = vld [vmem:[%s1723_s19 + $0x370] sm:$0xff] }
  0xa2   : > { %v569_v5 = vld [vmem:[%s1730_s29 + $0x360] sm:$0xff]  ;;  %1078 = vst [vmem:[%s1745_s20 + $0x348] sm:$0xff] %v822_v62  ;;  %v570_v8 = vld [vmem:[%s1730_s29 + $0x368] sm:$0xff]  ;;  %v571_v10 = vld [vmem:[%s1730_s29 + $0x370] sm:$0xff] }
  0xa3   : > { %v825_v7 = vsub.f32 %v313_v4, %v569_v5  ;;  %1079 = vst [vmem:[%s1745_s20 + $0x350] sm:$0xff] %v823_v2  ;;  %1080 = vst [vmem:[%s1745_s20 + $0x358] sm:$0xff] %v824_v3  ;;  %v826_v11 = vsub.f32 %v314_v6, %v570_v8  ;;  %v827_v12 = vsub.f32 %v315_v9, %v571_v10  ;;  %v316_v13 = vld [vmem:[%s1723_s19 + $0x378] sm:$0xff]  ;;  %v317_v15 = vld [vmem:[%s1723_s19 + $0x380] sm:$0xff] }
  0xa4   : > { %v572_v14 = vld [vmem:[%s1730_s29 + $0x378] sm:$0xff]  ;;  %v573_v17 = vld [vmem:[%s1730_s29 + $0x380] sm:$0xff]  ;;  %v318_v18 = vld [vmem:[%s1723_s19 + $0x388] sm:$0xff] }
  0xa5   : > { %1081 = vst [vmem:[%s1745_s20 + $0x360] sm:$0xff] %v825_v7  ;;  %v828_v16 = vsub.f32 %v316_v13, %v572_v14  ;;  %v574_v19 = vld [vmem:[%s1730_s29 + $0x388] sm:$0xff]  ;;  %1082 = vst [vmem:[%s1745_s20 + $0x368] sm:$0xff] %v826_v11  ;;  %v829_v20 = vsub.f32 %v317_v15, %v573_v17  ;;  %v319_v22 = vld [vmem:[%s1723_s19 + $0x390] sm:$0xff] }
  0xa6   : > { %1083 = vst [vmem:[%s1745_s20 + $0x370] sm:$0xff] %v827_v12  ;;  %v830_v21 = vsub.f32 %v318_v18, %v574_v19  ;;  %v575_v23 = vld [vmem:[%s1730_s29 + $0x390] sm:$0xff]  ;;  %v320_v24 = vld [vmem:[%s1723_s19 + $0x398] sm:$0xff]  ;;  %v321_v27 = vld [vmem:[%s1723_s19 + $0x3a0] sm:$0xff] }
  0xa7   : > { %1084 = vst [vmem:[%s1745_s20 + $0x378] sm:$0xff] %v828_v16  ;;  %v831_v25 = vsub.f32 %v319_v22, %v575_v23  ;;  %v576_v26 = vld [vmem:[%s1730_s29 + $0x398] sm:$0xff]  ;;  %v577_v28 = vld [vmem:[%s1730_s29 + $0x3a0] sm:$0xff]  ;;  %1085 = vst [vmem:[%s1745_s20 + $0x380] sm:$0xff] %v829_v20 }
  0xa8   : > { %1086 = vst [vmem:[%s1745_s20 + $0x388] sm:$0xff] %v830_v21  ;;  %v832_v29 = vsub.f32 %v320_v24, %v576_v26  ;;  %v833_v30 = vsub.f32 %v321_v27, %v577_v28  ;;  %v322_v31 = vld [vmem:[%s1723_s19 + $0x3a8] sm:$0xff]  ;;  %v323_v33 = vld [vmem:[%s1723_s19 + $0x3b0] sm:$0xff]  ;;  %v324_v36 = vld [vmem:[%s1723_s19 + $0x3b8] sm:$0xff] }
  0xa9   : > { %v578_v32 = vld [vmem:[%s1730_s29 + $0x3a8] sm:$0xff]  ;;  %1087 = vst [vmem:[%s1745_s20 + $0x390] sm:$0xff] %v831_v25  ;;  %v579_v35 = vld [vmem:[%s1730_s29 + $0x3b0] sm:$0xff]  ;;  %v580_v37 = vld [vmem:[%s1730_s29 + $0x3b8] sm:$0xff] }
  0xaa   : > { %v834_v34 = vsub.f32 %v322_v31, %v578_v32  ;;  %1088 = vst [vmem:[%s1745_s20 + $0x398] sm:$0xff] %v832_v29  ;;  %1089 = vst [vmem:[%s1745_s20 + $0x3a0] sm:$0xff] %v833_v30  ;;  %v835_v38 = vsub.f32 %v323_v33, %v579_v35  ;;  %v836_v39 = vsub.f32 %v324_v36, %v580_v37  ;;  %v325_v40 = vld [vmem:[%s1723_s19 + $0x3c0] sm:$0xff]  ;;  %v326_v42 = vld [vmem:[%s1723_s19 + $0x3c8] sm:$0xff] }
  0xab   : > { %v581_v41 = vld [vmem:[%s1730_s29 + $0x3c0] sm:$0xff]  ;;  %v582_v44 = vld [vmem:[%s1730_s29 + $0x3c8] sm:$0xff]  ;;  %v327_v45 = vld [vmem:[%s1723_s19 + $0x3d0] sm:$0xff] }
  0xac   : > { %1090 = vst [vmem:[%s1745_s20 + $0x3a8] sm:$0xff] %v834_v34  ;;  %v837_v43 = vsub.f32 %v325_v40, %v581_v41  ;;  %v583_v46 = vld [vmem:[%s1730_s29 + $0x3d0] sm:$0xff]  ;;  %1091 = vst [vmem:[%s1745_s20 + $0x3b0] sm:$0xff] %v835_v38  ;;  %v838_v47 = vsub.f32 %v326_v42, %v582_v44  ;;  %v328_v49 = vld [vmem:[%s1723_s19 + $0x3d8] sm:$0xff] }
  0xad   : > { %1092 = vst [vmem:[%s1745_s20 + $0x3b8] sm:$0xff] %v836_v39  ;;  %v839_v48 = vsub.f32 %v327_v45, %v583_v46  ;;  %v584_v50 = vld [vmem:[%s1730_s29 + $0x3d8] sm:$0xff]  ;;  %v329_v51 = vld [vmem:[%s1723_s19 + $0x3e0] sm:$0xff]  ;;  %v330_v54 = vld [vmem:[%s1723_s19 + $0x3e8] sm:$0xff] }
  0xae   : > { %1093 = vst [vmem:[%s1745_s20 + $0x3c0] sm:$0xff] %v837_v43  ;;  %v840_v52 = vsub.f32 %v328_v49, %v584_v50  ;;  %v585_v53 = vld [vmem:[%s1730_s29 + $0x3e0] sm:$0xff]  ;;  %v586_v55 = vld [vmem:[%s1730_s29 + $0x3e8] sm:$0xff]  ;;  %1094 = vst [vmem:[%s1745_s20 + $0x3c8] sm:$0xff] %v838_v47 }
  0xaf   : > { %1095 = vst [vmem:[%s1745_s20 + $0x3d0] sm:$0xff] %v839_v48  ;;  %v841_v56 = vsub.f32 %v329_v51, %v585_v53  ;;  %v842_v57 = vsub.f32 %v330_v54, %v586_v55  ;;  %v331_v58 = vld [vmem:[%s1723_s19 + $0x3f0] sm:$0xff]  ;;  %v332_v60 = vld [vmem:[%s1723_s19 + $0x3f8] sm:$0xff]  ;;  %v333_v63 = vld [vmem:[%s1723_s19 + $0x400] sm:$0xff] }
  0xb0   : > { %v587_v59 = vld [vmem:[%s1730_s29 + $0x3f0] sm:$0xff]  ;;  %1096 = vst [vmem:[%s1745_s20 + $0x3d8] sm:$0xff] %v840_v52  ;;  %v588_v62 = vld [vmem:[%s1730_s29 + $0x3f8] sm:$0xff]  ;;  %v589_v0 = vld [vmem:[%s1730_s29 + $0x400] sm:$0xff] }
  0xb1   : > { %v843_v61 = vsub.f32 %v331_v58, %v587_v59  ;;  %1097 = vst [vmem:[%s1745_s20 + $0x3e0] sm:$0xff] %v841_v56  ;;  %1098 = vst [vmem:[%s1745_s20 + $0x3e8] sm:$0xff] %v842_v57  ;;  %v844_v1 = vsub.f32 %v332_v60, %v588_v62  ;;  %v845_v2 = vsub.f32 %v333_v63, %v589_v0  ;;  %v334_v3 = vld [vmem:[%s1723_s19 + $0x408] sm:$0xff]  ;;  %v335_v5 = vld [vmem:[%s1723_s19 + $0x410] sm:$0xff] }
  0xb2   : > { %v590_v4 = vld [vmem:[%s1730_s29 + $0x408] sm:$0xff]  ;;  %v591_v7 = vld [vmem:[%s1730_s29 + $0x410] sm:$0xff]  ;;  %v336_v8 = vld [vmem:[%s1723_s19 + $0x418] sm:$0xff] }
  0xb3   : > { %1099 = vst [vmem:[%s1745_s20 + $0x3f0] sm:$0xff] %v843_v61  ;;  %v846_v6 = vsub.f32 %v334_v3, %v590_v4  ;;  %v592_v9 = vld [vmem:[%s1730_s29 + $0x418] sm:$0xff]  ;;  %1100 = vst [vmem:[%s1745_s20 + $0x3f8] sm:$0xff] %v844_v1  ;;  %v847_v10 = vsub.f32 %v335_v5, %v591_v7  ;;  %v337_v12 = vld [vmem:[%s1723_s19 + $0x420] sm:$0xff] }
  0xb4   : > { %1101 = vst [vmem:[%s1745_s20 + $0x400] sm:$0xff] %v845_v2  ;;  %v848_v11 = vsub.f32 %v336_v8, %v592_v9  ;;  %v593_v13 = vld [vmem:[%s1730_s29 + $0x420] sm:$0xff]  ;;  %v338_v14 = vld [vmem:[%s1723_s19 + $0x428] sm:$0xff]  ;;  %v339_v17 = vld [vmem:[%s1723_s19 + $0x430] sm:$0xff] }
  0xb5   : > { %1102 = vst [vmem:[%s1745_s20 + $0x408] sm:$0xff] %v846_v6  ;;  %v849_v15 = vsub.f32 %v337_v12, %v593_v13  ;;  %v594_v16 = vld [vmem:[%s1730_s29 + $0x428] sm:$0xff]  ;;  %v595_v18 = vld [vmem:[%s1730_s29 + $0x430] sm:$0xff]  ;;  %1103 = vst [vmem:[%s1745_s20 + $0x410] sm:$0xff] %v847_v10 }
  0xb6   : > { %1104 = vst [vmem:[%s1745_s20 + $0x418] sm:$0xff] %v848_v11  ;;  %v850_v19 = vsub.f32 %v338_v14, %v594_v16  ;;  %v851_v20 = vsub.f32 %v339_v17, %v595_v18  ;;  %v340_v21 = vld [vmem:[%s1723_s19 + $0x438] sm:$0xff]  ;;  %v341_v23 = vld [vmem:[%s1723_s19 + $0x440] sm:$0xff]  ;;  %v342_v26 = vld [vmem:[%s1723_s19 + $0x448] sm:$0xff] }
  0xb7   : > { %v596_v22 = vld [vmem:[%s1730_s29 + $0x438] sm:$0xff]  ;;  %1105 = vst [vmem:[%s1745_s20 + $0x420] sm:$0xff] %v849_v15  ;;  %v597_v25 = vld [vmem:[%s1730_s29 + $0x440] sm:$0xff]  ;;  %v598_v27 = vld [vmem:[%s1730_s29 + $0x448] sm:$0xff] }
  0xb8   : > { %v852_v24 = vsub.f32 %v340_v21, %v596_v22  ;;  %1106 = vst [vmem:[%s1745_s20 + $0x428] sm:$0xff] %v850_v19  ;;  %1107 = vst [vmem:[%s1745_s20 + $0x430] sm:$0xff] %v851_v20  ;;  %v853_v28 = vsub.f32 %v341_v23, %v597_v25  ;;  %v854_v29 = vsub.f32 %v342_v26, %v598_v27  ;;  %v343_v30 = vld [vmem:[%s1723_s19 + $0x450] sm:$0xff]  ;;  %v344_v32 = vld [vmem:[%s1723_s19 + $0x458] sm:$0xff] }
  0xb9   : > { %v599_v31 = vld [vmem:[%s1730_s29 + $0x450] sm:$0xff]  ;;  %v600_v34 = vld [vmem:[%s1730_s29 + $0x458] sm:$0xff]  ;;  %v345_v35 = vld [vmem:[%s1723_s19 + $0x460] sm:$0xff] }
  0xba   : > { %1108 = vst [vmem:[%s1745_s20 + $0x438] sm:$0xff] %v852_v24  ;;  %v855_v33 = vsub.f32 %v343_v30, %v599_v31  ;;  %v601_v36 = vld [vmem:[%s1730_s29 + $0x460] sm:$0xff]  ;;  %1109 = vst [vmem:[%s1745_s20 + $0x440] sm:$0xff] %v853_v28  ;;  %v856_v37 = vsub.f32 %v344_v32, %v600_v34  ;;  %v346_v39 = vld [vmem:[%s1723_s19 + $0x468] sm:$0xff] }
  0xbb   : > { %1110 = vst [vmem:[%s1745_s20 + $0x448] sm:$0xff] %v854_v29  ;;  %v857_v38 = vsub.f32 %v345_v35, %v601_v36  ;;  %v602_v40 = vld [vmem:[%s1730_s29 + $0x468] sm:$0xff]  ;;  %v347_v41 = vld [vmem:[%s1723_s19 + $0x470] sm:$0xff]  ;;  %v348_v44 = vld [vmem:[%s1723_s19 + $0x478] sm:$0xff] }
  0xbc   : > { %1111 = vst [vmem:[%s1745_s20 + $0x450] sm:$0xff] %v855_v33  ;;  %v858_v42 = vsub.f32 %v346_v39, %v602_v40  ;;  %v603_v43 = vld [vmem:[%s1730_s29 + $0x470] sm:$0xff]  ;;  %v604_v45 = vld [vmem:[%s1730_s29 + $0x478] sm:$0xff]  ;;  %1112 = vst [vmem:[%s1745_s20 + $0x458] sm:$0xff] %v856_v37 }
  0xbd   : > { %1113 = vst [vmem:[%s1745_s20 + $0x460] sm:$0xff] %v857_v38  ;;  %v859_v46 = vsub.f32 %v347_v41, %v603_v43  ;;  %v860_v47 = vsub.f32 %v348_v44, %v604_v45  ;;  %v349_v48 = vld [vmem:[%s1723_s19 + $0x480] sm:$0xff]  ;;  %v350_v50 = vld [vmem:[%s1723_s19 + $0x488] sm:$0xff]  ;;  %v351_v53 = vld [vmem:[%s1723_s19 + $0x490] sm:$0xff] }
  0xbe   : > { %v605_v49 = vld [vmem:[%s1730_s29 + $0x480] sm:$0xff]  ;;  %1114 = vst [vmem:[%s1745_s20 + $0x468] sm:$0xff] %v858_v42  ;;  %v606_v52 = vld [vmem:[%s1730_s29 + $0x488] sm:$0xff]  ;;  %v607_v54 = vld [vmem:[%s1730_s29 + $0x490] sm:$0xff] }
  0xbf   : > { %v861_v51 = vsub.f32 %v349_v48, %v605_v49  ;;  %1115 = vst [vmem:[%s1745_s20 + $0x470] sm:$0xff] %v859_v46  ;;  %1116 = vst [vmem:[%s1745_s20 + $0x478] sm:$0xff] %v860_v47  ;;  %v862_v55 = vsub.f32 %v350_v50, %v606_v52  ;;  %v863_v56 = vsub.f32 %v351_v53, %v607_v54  ;;  %v352_v57 = vld [vmem:[%s1723_s19 + $0x498] sm:$0xff]  ;;  %v353_v59 = vld [vmem:[%s1723_s19 + $0x4a0] sm:$0xff] }
  0xc0   : > { %v608_v58 = vld [vmem:[%s1730_s29 + $0x498] sm:$0xff]  ;;  %v609_v61 = vld [vmem:[%s1730_s29 + $0x4a0] sm:$0xff]  ;;  %v354_v62 = vld [vmem:[%s1723_s19 + $0x4a8] sm:$0xff] }
  0xc1   : > { %1117 = vst [vmem:[%s1745_s20 + $0x480] sm:$0xff] %v861_v51  ;;  %v864_v60 = vsub.f32 %v352_v57, %v608_v58  ;;  %v610_v63 = vld [vmem:[%s1730_s29 + $0x4a8] sm:$0xff]  ;;  %1118 = vst [vmem:[%s1745_s20 + $0x488] sm:$0xff] %v862_v55  ;;  %v865_v0 = vsub.f32 %v353_v59, %v609_v61  ;;  %v355_v2 = vld [vmem:[%s1723_s19 + $0x4b0] sm:$0xff] }
  0xc2   : > { %1119 = vst [vmem:[%s1745_s20 + $0x490] sm:$0xff] %v863_v56  ;;  %v866_v1 = vsub.f32 %v354_v62, %v610_v63  ;;  %v611_v3 = vld [vmem:[%s1730_s29 + $0x4b0] sm:$0xff]  ;;  %v356_v4 = vld [vmem:[%s1723_s19 + $0x4b8] sm:$0xff]  ;;  %v357_v7 = vld [vmem:[%s1723_s19 + $0x4c0] sm:$0xff] }
  0xc3   : > { %1120 = vst [vmem:[%s1745_s20 + $0x498] sm:$0xff] %v864_v60  ;;  %v867_v5 = vsub.f32 %v355_v2, %v611_v3  ;;  %v612_v6 = vld [vmem:[%s1730_s29 + $0x4b8] sm:$0xff]  ;;  %v613_v8 = vld [vmem:[%s1730_s29 + $0x4c0] sm:$0xff]  ;;  %1121 = vst [vmem:[%s1745_s20 + $0x4a0] sm:$0xff] %v865_v0 }
  0xc4   : > { %1122 = vst [vmem:[%s1745_s20 + $0x4a8] sm:$0xff] %v866_v1  ;;  %v868_v9 = vsub.f32 %v356_v4, %v612_v6  ;;  %v869_v10 = vsub.f32 %v357_v7, %v613_v8  ;;  %v358_v11 = vld [vmem:[%s1723_s19 + $0x4c8] sm:$0xff]  ;;  %v359_v13 = vld [vmem:[%s1723_s19 + $0x4d0] sm:$0xff]  ;;  %v360_v16 = vld [vmem:[%s1723_s19 + $0x4d8] sm:$0xff] }
  0xc5   : > { %v614_v12 = vld [vmem:[%s1730_s29 + $0x4c8] sm:$0xff]  ;;  %1123 = vst [vmem:[%s1745_s20 + $0x4b0] sm:$0xff] %v867_v5  ;;  %v615_v15 = vld [vmem:[%s1730_s29 + $0x4d0] sm:$0xff]  ;;  %v616_v17 = vld [vmem:[%s1730_s29 + $0x4d8] sm:$0xff] }
  0xc6   : > { %v870_v14 = vsub.f32 %v358_v11, %v614_v12  ;;  %1124 = vst [vmem:[%s1745_s20 + $0x4b8] sm:$0xff] %v868_v9  ;;  %1125 = vst [vmem:[%s1745_s20 + $0x4c0] sm:$0xff] %v869_v10  ;;  %v871_v18 = vsub.f32 %v359_v13, %v615_v15  ;;  %v872_v19 = vsub.f32 %v360_v16, %v616_v17  ;;  %v361_v20 = vld [vmem:[%s1723_s19 + $0x4e0] sm:$0xff]  ;;  %v362_v22 = vld [vmem:[%s1723_s19 + $0x4e8] sm:$0xff] }
  0xc7   : > { %v617_v21 = vld [vmem:[%s1730_s29 + $0x4e0] sm:$0xff]  ;;  %v618_v24 = vld [vmem:[%s1730_s29 + $0x4e8] sm:$0xff]  ;;  %v363_v25 = vld [vmem:[%s1723_s19 + $0x4f0] sm:$0xff] }
  0xc8   : > { %1126 = vst [vmem:[%s1745_s20 + $0x4c8] sm:$0xff] %v870_v14  ;;  %v873_v23 = vsub.f32 %v361_v20, %v617_v21  ;;  %v619_v26 = vld [vmem:[%s1730_s29 + $0x4f0] sm:$0xff]  ;;  %1127 = vst [vmem:[%s1745_s20 + $0x4d0] sm:$0xff] %v871_v18  ;;  %v874_v27 = vsub.f32 %v362_v22, %v618_v24  ;;  %v364_v29 = vld [vmem:[%s1723_s19 + $0x4f8] sm:$0xff] }
  0xc9   : > { %1128 = vst [vmem:[%s1745_s20 + $0x4d8] sm:$0xff] %v872_v19  ;;  %v875_v28 = vsub.f32 %v363_v25, %v619_v26  ;;  %v620_v30 = vld [vmem:[%s1730_s29 + $0x4f8] sm:$0xff]  ;;  %v365_v31 = vld [vmem:[%s1723_s19 + $0x500] sm:$0xff]  ;;  %v366_v34 = vld [vmem:[%s1723_s19 + $0x508] sm:$0xff] }
  0xca   : > { %1129 = vst [vmem:[%s1745_s20 + $0x4e0] sm:$0xff] %v873_v23  ;;  %v876_v32 = vsub.f32 %v364_v29, %v620_v30  ;;  %v621_v33 = vld [vmem:[%s1730_s29 + $0x500] sm:$0xff]  ;;  %v622_v35 = vld [vmem:[%s1730_s29 + $0x508] sm:$0xff]  ;;  %1130 = vst [vmem:[%s1745_s20 + $0x4e8] sm:$0xff] %v874_v27 }
  0xcb   : > { %1131 = vst [vmem:[%s1745_s20 + $0x4f0] sm:$0xff] %v875_v28  ;;  %v877_v36 = vsub.f32 %v365_v31, %v621_v33  ;;  %v878_v37 = vsub.f32 %v366_v34, %v622_v35  ;;  %v367_v38 = vld [vmem:[%s1723_s19 + $0x510] sm:$0xff]  ;;  %v368_v40 = vld [vmem:[%s1723_s19 + $0x518] sm:$0xff]  ;;  %v369_v43 = vld [vmem:[%s1723_s19 + $0x520] sm:$0xff] }
  0xcc   : > { %v623_v39 = vld [vmem:[%s1730_s29 + $0x510] sm:$0xff]  ;;  %1132 = vst [vmem:[%s1745_s20 + $0x4f8] sm:$0xff] %v876_v32  ;;  %v624_v42 = vld [vmem:[%s1730_s29 + $0x518] sm:$0xff]  ;;  %v625_v44 = vld [vmem:[%s1730_s29 + $0x520] sm:$0xff] }
  0xcd   : > { %v879_v41 = vsub.f32 %v367_v38, %v623_v39  ;;  %1133 = vst [vmem:[%s1745_s20 + $0x500] sm:$0xff] %v877_v36  ;;  %1134 = vst [vmem:[%s1745_s20 + $0x508] sm:$0xff] %v878_v37  ;;  %v880_v45 = vsub.f32 %v368_v40, %v624_v42  ;;  %v881_v46 = vsub.f32 %v369_v43, %v625_v44  ;;  %v370_v47 = vld [vmem:[%s1723_s19 + $0x528] sm:$0xff]  ;;  %v371_v49 = vld [vmem:[%s1723_s19 + $0x530] sm:$0xff] }
  0xce   : > { %v626_v48 = vld [vmem:[%s1730_s29 + $0x528] sm:$0xff]  ;;  %v627_v51 = vld [vmem:[%s1730_s29 + $0x530] sm:$0xff]  ;;  %v372_v52 = vld [vmem:[%s1723_s19 + $0x538] sm:$0xff] }
  0xcf   : > { %1135 = vst [vmem:[%s1745_s20 + $0x510] sm:$0xff] %v879_v41  ;;  %v882_v50 = vsub.f32 %v370_v47, %v626_v48  ;;  %v628_v53 = vld [vmem:[%s1730_s29 + $0x538] sm:$0xff]  ;;  %1136 = vst [vmem:[%s1745_s20 + $0x518] sm:$0xff] %v880_v45  ;;  %v883_v54 = vsub.f32 %v371_v49, %v627_v51  ;;  %v373_v56 = vld [vmem:[%s1723_s19 + $0x540] sm:$0xff] }
  0xd0   : > { %1137 = vst [vmem:[%s1745_s20 + $0x520] sm:$0xff] %v881_v46  ;;  %v884_v55 = vsub.f32 %v372_v52, %v628_v53  ;;  %v629_v57 = vld [vmem:[%s1730_s29 + $0x540] sm:$0xff]  ;;  %v374_v58 = vld [vmem:[%s1723_s19 + $0x548] sm:$0xff]  ;;  %v375_v61 = vld [vmem:[%s1723_s19 + $0x550] sm:$0xff] }
  0xd1   : > { %1138 = vst [vmem:[%s1745_s20 + $0x528] sm:$0xff] %v882_v50  ;;  %v885_v59 = vsub.f32 %v373_v56, %v629_v57  ;;  %v630_v60 = vld [vmem:[%s1730_s29 + $0x548] sm:$0xff]  ;;  %v631_v62 = vld [vmem:[%s1730_s29 + $0x550] sm:$0xff]  ;;  %1139 = vst [vmem:[%s1745_s20 + $0x530] sm:$0xff] %v883_v54 }
  0xd2   : > { %1140 = vst [vmem:[%s1745_s20 + $0x538] sm:$0xff] %v884_v55  ;;  %v886_v63 = vsub.f32 %v374_v58, %v630_v60  ;;  %v887_v0 = vsub.f32 %v375_v61, %v631_v62  ;;  %v376_v1 = vld [vmem:[%s1723_s19 + $0x558] sm:$0xff]  ;;  %v377_v3 = vld [vmem:[%s1723_s19 + $0x560] sm:$0xff]  ;;  %v378_v6 = vld [vmem:[%s1723_s19 + $0x568] sm:$0xff] }
  0xd3   : > { %v632_v2 = vld [vmem:[%s1730_s29 + $0x558] sm:$0xff]  ;;  %1141 = vst [vmem:[%s1745_s20 + $0x540] sm:$0xff] %v885_v59  ;;  %v633_v5 = vld [vmem:[%s1730_s29 + $0x560] sm:$0xff]  ;;  %v634_v7 = vld [vmem:[%s1730_s29 + $0x568] sm:$0xff] }
  0xd4   : > { %v888_v4 = vsub.f32 %v376_v1, %v632_v2  ;;  %1142 = vst [vmem:[%s1745_s20 + $0x548] sm:$0xff] %v886_v63  ;;  %1143 = vst [vmem:[%s1745_s20 + $0x550] sm:$0xff] %v887_v0  ;;  %v889_v8 = vsub.f32 %v377_v3, %v633_v5  ;;  %v890_v9 = vsub.f32 %v378_v6, %v634_v7  ;;  %v379_v10 = vld [vmem:[%s1723_s19 + $0x570] sm:$0xff]  ;;  %v380_v12 = vld [vmem:[%s1723_s19 + $0x578] sm:$0xff] }
  0xd5   : > { %v635_v11 = vld [vmem:[%s1730_s29 + $0x570] sm:$0xff]  ;;  %v636_v14 = vld [vmem:[%s1730_s29 + $0x578] sm:$0xff]  ;;  %v381_v15 = vld [vmem:[%s1723_s19 + $0x580] sm:$0xff] }
  0xd6   : > { %1144 = vst [vmem:[%s1745_s20 + $0x558] sm:$0xff] %v888_v4  ;;  %v891_v13 = vsub.f32 %v379_v10, %v635_v11  ;;  %v637_v16 = vld [vmem:[%s1730_s29 + $0x580] sm:$0xff]  ;;  %1145 = vst [vmem:[%s1745_s20 + $0x560] sm:$0xff] %v889_v8  ;;  %v892_v17 = vsub.f32 %v380_v12, %v636_v14  ;;  %v382_v19 = vld [vmem:[%s1723_s19 + $0x588] sm:$0xff] }
  0xd7   : > { %1146 = vst [vmem:[%s1745_s20 + $0x568] sm:$0xff] %v890_v9  ;;  %v893_v18 = vsub.f32 %v381_v15, %v637_v16  ;;  %v638_v20 = vld [vmem:[%s1730_s29 + $0x588] sm:$0xff]  ;;  %v383_v21 = vld [vmem:[%s1723_s19 + $0x590] sm:$0xff]  ;;  %v384_v24 = vld [vmem:[%s1723_s19 + $0x598] sm:$0xff] }
  0xd8   : > { %1147 = vst [vmem:[%s1745_s20 + $0x570] sm:$0xff] %v891_v13  ;;  %v894_v22 = vsub.f32 %v382_v19, %v638_v20  ;;  %v639_v23 = vld [vmem:[%s1730_s29 + $0x590] sm:$0xff]  ;;  %v640_v25 = vld [vmem:[%s1730_s29 + $0x598] sm:$0xff]  ;;  %1148 = vst [vmem:[%s1745_s20 + $0x578] sm:$0xff] %v892_v17 }
  0xd9   : > { %1149 = vst [vmem:[%s1745_s20 + $0x580] sm:$0xff] %v893_v18  ;;  %v895_v26 = vsub.f32 %v383_v21, %v639_v23  ;;  %v896_v27 = vsub.f32 %v384_v24, %v640_v25  ;;  %v385_v28 = vld [vmem:[%s1723_s19 + $0x5a0] sm:$0xff]  ;;  %v386_v30 = vld [vmem:[%s1723_s19 + $0x5a8] sm:$0xff]  ;;  %v387_v33 = vld [vmem:[%s1723_s19 + $0x5b0] sm:$0xff] }
  0xda   : > { %v641_v29 = vld [vmem:[%s1730_s29 + $0x5a0] sm:$0xff]  ;;  %1150 = vst [vmem:[%s1745_s20 + $0x588] sm:$0xff] %v894_v22  ;;  %v642_v32 = vld [vmem:[%s1730_s29 + $0x5a8] sm:$0xff]  ;;  %v643_v34 = vld [vmem:[%s1730_s29 + $0x5b0] sm:$0xff] }
  0xdb   : > { %v897_v31 = vsub.f32 %v385_v28, %v641_v29  ;;  %1151 = vst [vmem:[%s1745_s20 + $0x590] sm:$0xff] %v895_v26  ;;  %1152 = vst [vmem:[%s1745_s20 + $0x598] sm:$0xff] %v896_v27  ;;  %v898_v35 = vsub.f32 %v386_v30, %v642_v32  ;;  %v899_v36 = vsub.f32 %v387_v33, %v643_v34  ;;  %v388_v37 = vld [vmem:[%s1723_s19 + $0x5b8] sm:$0xff]  ;;  %v389_v39 = vld [vmem:[%s1723_s19 + $0x5c0] sm:$0xff] }
  0xdc   : > { %v644_v38 = vld [vmem:[%s1730_s29 + $0x5b8] sm:$0xff]  ;;  %v645_v41 = vld [vmem:[%s1730_s29 + $0x5c0] sm:$0xff]  ;;  %v390_v42 = vld [vmem:[%s1723_s19 + $0x5c8] sm:$0xff] }
  0xdd   : > { %1153 = vst [vmem:[%s1745_s20 + $0x5a0] sm:$0xff] %v897_v31  ;;  %v900_v40 = vsub.f32 %v388_v37, %v644_v38  ;;  %v646_v43 = vld [vmem:[%s1730_s29 + $0x5c8] sm:$0xff]  ;;  %1154 = vst [vmem:[%s1745_s20 + $0x5a8] sm:$0xff] %v898_v35  ;;  %v901_v44 = vsub.f32 %v389_v39, %v645_v41  ;;  %v391_v46 = vld [vmem:[%s1723_s19 + $0x5d0] sm:$0xff] }
  0xde   : > { %1155 = vst [vmem:[%s1745_s20 + $0x5b0] sm:$0xff] %v899_v36  ;;  %v902_v45 = vsub.f32 %v390_v42, %v646_v43  ;;  %v647_v47 = vld [vmem:[%s1730_s29 + $0x5d0] sm:$0xff]  ;;  %v392_v48 = vld [vmem:[%s1723_s19 + $0x5d8] sm:$0xff]  ;;  %v393_v51 = vld [vmem:[%s1723_s19 + $0x5e0] sm:$0xff] }
  0xdf   : > { %1156 = vst [vmem:[%s1745_s20 + $0x5b8] sm:$0xff] %v900_v40  ;;  %v903_v49 = vsub.f32 %v391_v46, %v647_v47  ;;  %v648_v50 = vld [vmem:[%s1730_s29 + $0x5d8] sm:$0xff]  ;;  %v649_v52 = vld [vmem:[%s1730_s29 + $0x5e0] sm:$0xff]  ;;  %1157 = vst [vmem:[%s1745_s20 + $0x5c0] sm:$0xff] %v901_v44 }
  0xe0   : > { %1158 = vst [vmem:[%s1745_s20 + $0x5c8] sm:$0xff] %v902_v45  ;;  %v904_v53 = vsub.f32 %v392_v48, %v648_v50  ;;  %v905_v54 = vsub.f32 %v393_v51, %v649_v52  ;;  %v394_v55 = vld [vmem:[%s1723_s19 + $0x5e8] sm:$0xff]  ;;  %v395_v57 = vld [vmem:[%s1723_s19 + $0x5f0] sm:$0xff]  ;;  %v396_v60 = vld [vmem:[%s1723_s19 + $0x5f8] sm:$0xff] }
  0xe1   : > { %v650_v56 = vld [vmem:[%s1730_s29 + $0x5e8] sm:$0xff]  ;;  %1159 = vst [vmem:[%s1745_s20 + $0x5d0] sm:$0xff] %v903_v49  ;;  %v651_v59 = vld [vmem:[%s1730_s29 + $0x5f0] sm:$0xff]  ;;  %v652_v61 = vld [vmem:[%s1730_s29 + $0x5f8] sm:$0xff] }
  0xe2   : > { %v906_v58 = vsub.f32 %v394_v55, %v650_v56  ;;  %1160 = vst [vmem:[%s1745_s20 + $0x5d8] sm:$0xff] %v904_v53  ;;  %1161 = vst [vmem:[%s1745_s20 + $0x5e0] sm:$0xff] %v905_v54  ;;  %v907_v62 = vsub.f32 %v395_v57, %v651_v59  ;;  %v908_v63 = vsub.f32 %v396_v60, %v652_v61  ;;  %v397_v0 = vld [vmem:[%s1723_s19 + $0x600] sm:$0xff]  ;;  %v398_v2 = vld [vmem:[%s1723_s19 + $0x608] sm:$0xff] }
  0xe3   : > { %v653_v1 = vld [vmem:[%s1730_s29 + $0x600] sm:$0xff]  ;;  %v654_v4 = vld [vmem:[%s1730_s29 + $0x608] sm:$0xff]  ;;  %v399_v5 = vld [vmem:[%s1723_s19 + $0x610] sm:$0xff] }
  0xe4   : > { %1162 = vst [vmem:[%s1745_s20 + $0x5e8] sm:$0xff] %v906_v58  ;;  %v909_v3 = vsub.f32 %v397_v0, %v653_v1  ;;  %v655_v6 = vld [vmem:[%s1730_s29 + $0x610] sm:$0xff]  ;;  %1163 = vst [vmem:[%s1745_s20 + $0x5f0] sm:$0xff] %v907_v62  ;;  %v910_v7 = vsub.f32 %v398_v2, %v654_v4  ;;  %v400_v9 = vld [vmem:[%s1723_s19 + $0x618] sm:$0xff] }
  0xe5   : > { %1164 = vst [vmem:[%s1745_s20 + $0x5f8] sm:$0xff] %v908_v63  ;;  %v911_v8 = vsub.f32 %v399_v5, %v655_v6  ;;  %v656_v10 = vld [vmem:[%s1730_s29 + $0x618] sm:$0xff]  ;;  %v401_v11 = vld [vmem:[%s1723_s19 + $0x620] sm:$0xff]  ;;  %v402_v14 = vld [vmem:[%s1723_s19 + $0x628] sm:$0xff] }
  0xe6   : > { %1165 = vst [vmem:[%s1745_s20 + $0x600] sm:$0xff] %v909_v3  ;;  %v912_v12 = vsub.f32 %v400_v9, %v656_v10  ;;  %v657_v13 = vld [vmem:[%s1730_s29 + $0x620] sm:$0xff]  ;;  %v658_v15 = vld [vmem:[%s1730_s29 + $0x628] sm:$0xff]  ;;  %1166 = vst [vmem:[%s1745_s20 + $0x608] sm:$0xff] %v910_v7 }
  0xe7   : > { %1167 = vst [vmem:[%s1745_s20 + $0x610] sm:$0xff] %v911_v8  ;;  %v913_v16 = vsub.f32 %v401_v11, %v657_v13  ;;  %v914_v17 = vsub.f32 %v402_v14, %v658_v15  ;;  %v403_v18 = vld [vmem:[%s1723_s19 + $0x630] sm:$0xff]  ;;  %v404_v20 = vld [vmem:[%s1723_s19 + $0x638] sm:$0xff]  ;;  %v405_v23 = vld [vmem:[%s1723_s19 + $0x640] sm:$0xff] }
  0xe8   : > { %v659_v19 = vld [vmem:[%s1730_s29 + $0x630] sm:$0xff]  ;;  %1168 = vst [vmem:[%s1745_s20 + $0x618] sm:$0xff] %v912_v12  ;;  %v660_v22 = vld [vmem:[%s1730_s29 + $0x638] sm:$0xff]  ;;  %v661_v24 = vld [vmem:[%s1730_s29 + $0x640] sm:$0xff] }
  0xe9   : > { %v915_v21 = vsub.f32 %v403_v18, %v659_v19  ;;  %1169 = vst [vmem:[%s1745_s20 + $0x620] sm:$0xff] %v913_v16  ;;  %1170 = vst [vmem:[%s1745_s20 + $0x628] sm:$0xff] %v914_v17  ;;  %v916_v25 = vsub.f32 %v404_v20, %v660_v22  ;;  %v917_v26 = vsub.f32 %v405_v23, %v661_v24  ;;  %v406_v27 = vld [vmem:[%s1723_s19 + $0x648] sm:$0xff]  ;;  %v407_v29 = vld [vmem:[%s1723_s19 + $0x650] sm:$0xff] }
  0xea   : > { %v662_v28 = vld [vmem:[%s1730_s29 + $0x648] sm:$0xff]  ;;  %v663_v31 = vld [vmem:[%s1730_s29 + $0x650] sm:$0xff]  ;;  %v408_v32 = vld [vmem:[%s1723_s19 + $0x658] sm:$0xff] }
  0xeb   : > { %1171 = vst [vmem:[%s1745_s20 + $0x630] sm:$0xff] %v915_v21  ;;  %v918_v30 = vsub.f32 %v406_v27, %v662_v28  ;;  %v664_v33 = vld [vmem:[%s1730_s29 + $0x658] sm:$0xff]  ;;  %1172 = vst [vmem:[%s1745_s20 + $0x638] sm:$0xff] %v916_v25  ;;  %v919_v34 = vsub.f32 %v407_v29, %v663_v31  ;;  %v409_v36 = vld [vmem:[%s1723_s19 + $0x660] sm:$0xff] }
  0xec   : > { %1173 = vst [vmem:[%s1745_s20 + $0x640] sm:$0xff] %v917_v26  ;;  %v920_v35 = vsub.f32 %v408_v32, %v664_v33  ;;  %v665_v37 = vld [vmem:[%s1730_s29 + $0x660] sm:$0xff]  ;;  %v410_v38 = vld [vmem:[%s1723_s19 + $0x668] sm:$0xff]  ;;  %v411_v41 = vld [vmem:[%s1723_s19 + $0x670] sm:$0xff] }
  0xed   : > { %1174 = vst [vmem:[%s1745_s20 + $0x648] sm:$0xff] %v918_v30  ;;  %v921_v39 = vsub.f32 %v409_v36, %v665_v37  ;;  %v666_v40 = vld [vmem:[%s1730_s29 + $0x668] sm:$0xff]  ;;  %v667_v42 = vld [vmem:[%s1730_s29 + $0x670] sm:$0xff]  ;;  %1175 = vst [vmem:[%s1745_s20 + $0x650] sm:$0xff] %v919_v34 }
  0xee   : > { %1176 = vst [vmem:[%s1745_s20 + $0x658] sm:$0xff] %v920_v35  ;;  %v922_v43 = vsub.f32 %v410_v38, %v666_v40  ;;  %v923_v44 = vsub.f32 %v411_v41, %v667_v42  ;;  %v412_v45 = vld [vmem:[%s1723_s19 + $0x678] sm:$0xff]  ;;  %v413_v47 = vld [vmem:[%s1723_s19 + $0x680] sm:$0xff]  ;;  %v414_v50 = vld [vmem:[%s1723_s19 + $0x688] sm:$0xff] }
  0xef   : > { %v668_v46 = vld [vmem:[%s1730_s29 + $0x678] sm:$0xff]  ;;  %1177 = vst [vmem:[%s1745_s20 + $0x660] sm:$0xff] %v921_v39  ;;  %v669_v49 = vld [vmem:[%s1730_s29 + $0x680] sm:$0xff]  ;;  %v670_v51 = vld [vmem:[%s1730_s29 + $0x688] sm:$0xff] }
  0xf0   : > { %v924_v48 = vsub.f32 %v412_v45, %v668_v46  ;;  %1178 = vst [vmem:[%s1745_s20 + $0x668] sm:$0xff] %v922_v43  ;;  %1179 = vst [vmem:[%s1745_s20 + $0x670] sm:$0xff] %v923_v44  ;;  %v925_v52 = vsub.f32 %v413_v47, %v669_v49  ;;  %v926_v53 = vsub.f32 %v414_v50, %v670_v51  ;;  %v415_v54 = vld [vmem:[%s1723_s19 + $0x690] sm:$0xff]  ;;  %v416_v56 = vld [vmem:[%s1723_s19 + $0x698] sm:$0xff] }
  0xf1   : > { %v671_v55 = vld [vmem:[%s1730_s29 + $0x690] sm:$0xff]  ;;  %v672_v58 = vld [vmem:[%s1730_s29 + $0x698] sm:$0xff]  ;;  %v417_v59 = vld [vmem:[%s1723_s19 + $0x6a0] sm:$0xff] }
  0xf2   : > { %1180 = vst [vmem:[%s1745_s20 + $0x678] sm:$0xff] %v924_v48  ;;  %v927_v57 = vsub.f32 %v415_v54, %v671_v55  ;;  %v673_v60 = vld [vmem:[%s1730_s29 + $0x6a0] sm:$0xff]  ;;  %1181 = vst [vmem:[%s1745_s20 + $0x680] sm:$0xff] %v925_v52  ;;  %v928_v61 = vsub.f32 %v416_v56, %v672_v58  ;;  %v418_v63 = vld [vmem:[%s1723_s19 + $0x6a8] sm:$0xff] }
  0xf3   : > { %1182 = vst [vmem:[%s1745_s20 + $0x688] sm:$0xff] %v926_v53  ;;  %v929_v62 = vsub.f32 %v417_v59, %v673_v60  ;;  %v674_v0 = vld [vmem:[%s1730_s29 + $0x6a8] sm:$0xff]  ;;  %v419_v1 = vld [vmem:[%s1723_s19 + $0x6b0] sm:$0xff]  ;;  %v420_v4 = vld [vmem:[%s1723_s19 + $0x6b8] sm:$0xff] }
  0xf4   : > { %1183 = vst [vmem:[%s1745_s20 + $0x690] sm:$0xff] %v927_v57  ;;  %v930_v2 = vsub.f32 %v418_v63, %v674_v0  ;;  %v675_v3 = vld [vmem:[%s1730_s29 + $0x6b0] sm:$0xff]  ;;  %v676_v5 = vld [vmem:[%s1730_s29 + $0x6b8] sm:$0xff]  ;;  %1184 = vst [vmem:[%s1745_s20 + $0x698] sm:$0xff] %v928_v61 }
  0xf5   : > { %1185 = vst [vmem:[%s1745_s20 + $0x6a0] sm:$0xff] %v929_v62  ;;  %v931_v6 = vsub.f32 %v419_v1, %v675_v3  ;;  %v932_v7 = vsub.f32 %v420_v4, %v676_v5  ;;  %v421_v8 = vld [vmem:[%s1723_s19 + $0x6c0] sm:$0xff]  ;;  %v422_v10 = vld [vmem:[%s1723_s19 + $0x6c8] sm:$0xff]  ;;  %v423_v13 = vld [vmem:[%s1723_s19 + $0x6d0] sm:$0xff] }
  0xf6   : > { %v677_v9 = vld [vmem:[%s1730_s29 + $0x6c0] sm:$0xff]  ;;  %1186 = vst [vmem:[%s1745_s20 + $0x6a8] sm:$0xff] %v930_v2  ;;  %v678_v12 = vld [vmem:[%s1730_s29 + $0x6c8] sm:$0xff]  ;;  %v679_v14 = vld [vmem:[%s1730_s29 + $0x6d0] sm:$0xff] }
  0xf7   : > { %v933_v11 = vsub.f32 %v421_v8, %v677_v9  ;;  %1187 = vst [vmem:[%s1745_s20 + $0x6b0] sm:$0xff] %v931_v6  ;;  %1188 = vst [vmem:[%s1745_s20 + $0x6b8] sm:$0xff] %v932_v7  ;;  %v934_v15 = vsub.f32 %v422_v10, %v678_v12  ;;  %v935_v16 = vsub.f32 %v423_v13, %v679_v14  ;;  %v424_v17 = vld [vmem:[%s1723_s19 + $0x6d8] sm:$0xff]  ;;  %v425_v19 = vld [vmem:[%s1723_s19 + $0x6e0] sm:$0xff] }
  0xf8   : > { %v680_v18 = vld [vmem:[%s1730_s29 + $0x6d8] sm:$0xff]  ;;  %v681_v21 = vld [vmem:[%s1730_s29 + $0x6e0] sm:$0xff]  ;;  %v426_v22 = vld [vmem:[%s1723_s19 + $0x6e8] sm:$0xff] }
  0xf9   : > { %1189 = vst [vmem:[%s1745_s20 + $0x6c0] sm:$0xff] %v933_v11  ;;  %v936_v20 = vsub.f32 %v424_v17, %v680_v18  ;;  %v682_v23 = vld [vmem:[%s1730_s29 + $0x6e8] sm:$0xff]  ;;  %1190 = vst [vmem:[%s1745_s20 + $0x6c8] sm:$0xff] %v934_v15  ;;  %v937_v24 = vsub.f32 %v425_v19, %v681_v21  ;;  %v427_v26 = vld [vmem:[%s1723_s19 + $0x6f0] sm:$0xff] }
  0xfa   : > { %1191 = vst [vmem:[%s1745_s20 + $0x6d0] sm:$0xff] %v935_v16  ;;  %v938_v25 = vsub.f32 %v426_v22, %v682_v23  ;;  %v683_v27 = vld [vmem:[%s1730_s29 + $0x6f0] sm:$0xff]  ;;  %v428_v28 = vld [vmem:[%s1723_s19 + $0x6f8] sm:$0xff]  ;;  %v429_v31 = vld [vmem:[%s1723_s19 + $0x700] sm:$0xff] }
  0xfb   : > { %1192 = vst [vmem:[%s1745_s20 + $0x6d8] sm:$0xff] %v936_v20  ;;  %v939_v29 = vsub.f32 %v427_v26, %v683_v27  ;;  %v684_v30 = vld [vmem:[%s1730_s29 + $0x6f8] sm:$0xff]  ;;  %v685_v32 = vld [vmem:[%s1730_s29 + $0x700] sm:$0xff]  ;;  %1193 = vst [vmem:[%s1745_s20 + $0x6e0] sm:$0xff] %v937_v24 }
  0xfc   : > { %1194 = vst [vmem:[%s1745_s20 + $0x6e8] sm:$0xff] %v938_v25  ;;  %v940_v33 = vsub.f32 %v428_v28, %v684_v30  ;;  %v941_v34 = vsub.f32 %v429_v31, %v685_v32  ;;  %v430_v35 = vld [vmem:[%s1723_s19 + $0x708] sm:$0xff]  ;;  %v431_v37 = vld [vmem:[%s1723_s19 + $0x710] sm:$0xff]  ;;  %v432_v40 = vld [vmem:[%s1723_s19 + $0x718] sm:$0xff] }
  0xfd   : > { %v686_v36 = vld [vmem:[%s1730_s29 + $0x708] sm:$0xff]  ;;  %1195 = vst [vmem:[%s1745_s20 + $0x6f0] sm:$0xff] %v939_v29  ;;  %v687_v39 = vld [vmem:[%s1730_s29 + $0x710] sm:$0xff]  ;;  %v688_v41 = vld [vmem:[%s1730_s29 + $0x718] sm:$0xff] }
  0xfe   : > { %v942_v38 = vsub.f32 %v430_v35, %v686_v36  ;;  %1196 = vst [vmem:[%s1745_s20 + $0x6f8] sm:$0xff] %v940_v33  ;;  %1197 = vst [vmem:[%s1745_s20 + $0x700] sm:$0xff] %v941_v34  ;;  %v943_v42 = vsub.f32 %v431_v37, %v687_v39  ;;  %v944_v43 = vsub.f32 %v432_v40, %v688_v41  ;;  %v433_v44 = vld [vmem:[%s1723_s19 + $0x720] sm:$0xff]  ;;  %v434_v46 = vld [vmem:[%s1723_s19 + $0x728] sm:$0xff] }
  0xff   : > { %v689_v45 = vld [vmem:[%s1730_s29 + $0x720] sm:$0xff]  ;;  %v690_v48 = vld [vmem:[%s1730_s29 + $0x728] sm:$0xff]  ;;  %v435_v49 = vld [vmem:[%s1723_s19 + $0x730] sm:$0xff] }
 0x100   : > { %1198 = vst [vmem:[%s1745_s20 + $0x708] sm:$0xff] %v942_v38  ;;  %v945_v47 = vsub.f32 %v433_v44, %v689_v45  ;;  %v691_v50 = vld [vmem:[%s1730_s29 + $0x730] sm:$0xff]  ;;  %1199 = vst [vmem:[%s1745_s20 + $0x710] sm:$0xff] %v943_v42  ;;  %v946_v51 = vsub.f32 %v434_v46, %v690_v48  ;;  %v436_v53 = vld [vmem:[%s1723_s19 + $0x738] sm:$0xff] }
 0x101   : > { %1200 = vst [vmem:[%s1745_s20 + $0x718] sm:$0xff] %v944_v43  ;;  %v947_v52 = vsub.f32 %v435_v49, %v691_v50  ;;  %v692_v54 = vld [vmem:[%s1730_s29 + $0x738] sm:$0xff]  ;;  %v437_v55 = vld [vmem:[%s1723_s19 + $0x740] sm:$0xff]  ;;  %v438_v58 = vld [vmem:[%s1723_s19 + $0x748] sm:$0xff] }
 0x102   : > { %1201 = vst [vmem:[%s1745_s20 + $0x720] sm:$0xff] %v945_v47  ;;  %v948_v56 = vsub.f32 %v436_v53, %v692_v54  ;;  %v693_v57 = vld [vmem:[%s1730_s29 + $0x740] sm:$0xff]  ;;  %v694_v59 = vld [vmem:[%s1730_s29 + $0x748] sm:$0xff]  ;;  %1202 = vst [vmem:[%s1745_s20 + $0x728] sm:$0xff] %v946_v51 }
 0x103   : > { %1203 = vst [vmem:[%s1745_s20 + $0x730] sm:$0xff] %v947_v52  ;;  %v949_v60 = vsub.f32 %v437_v55, %v693_v57  ;;  %v950_v61 = vsub.f32 %v438_v58, %v694_v59  ;;  %v439_v62 = vld [vmem:[%s1723_s19 + $0x750] sm:$0xff]  ;;  %v440_v0 = vld [vmem:[%s1723_s19 + $0x758] sm:$0xff]  ;;  %v441_v3 = vld [vmem:[%s1723_s19 + $0x760] sm:$0xff] }
 0x104   : > { %v695_v63 = vld [vmem:[%s1730_s29 + $0x750] sm:$0xff]  ;;  %1204 = vst [vmem:[%s1745_s20 + $0x738] sm:$0xff] %v948_v56  ;;  %v696_v2 = vld [vmem:[%s1730_s29 + $0x758] sm:$0xff]  ;;  %v697_v4 = vld [vmem:[%s1730_s29 + $0x760] sm:$0xff] }
 0x105   : > { %v951_v1 = vsub.f32 %v439_v62, %v695_v63  ;;  %1205 = vst [vmem:[%s1745_s20 + $0x740] sm:$0xff] %v949_v60  ;;  %1206 = vst [vmem:[%s1745_s20 + $0x748] sm:$0xff] %v950_v61  ;;  %v952_v5 = vsub.f32 %v440_v0, %v696_v2  ;;  %v953_v6 = vsub.f32 %v441_v3, %v697_v4  ;;  %v442_v7 = vld [vmem:[%s1723_s19 + $0x768] sm:$0xff]  ;;  %v443_v9 = vld [vmem:[%s1723_s19 + $0x770] sm:$0xff] }
 0x106   : > { %v698_v8 = vld [vmem:[%s1730_s29 + $0x768] sm:$0xff]  ;;  %v699_v11 = vld [vmem:[%s1730_s29 + $0x770] sm:$0xff]  ;;  %v444_v12 = vld [vmem:[%s1723_s19 + $0x778] sm:$0xff] }
 0x107   : > { %1207 = vst [vmem:[%s1745_s20 + $0x750] sm:$0xff] %v951_v1  ;;  %v954_v10 = vsub.f32 %v442_v7, %v698_v8  ;;  %v700_v13 = vld [vmem:[%s1730_s29 + $0x778] sm:$0xff]  ;;  %1208 = vst [vmem:[%s1745_s20 + $0x758] sm:$0xff] %v952_v5  ;;  %v955_v14 = vsub.f32 %v443_v9, %v699_v11  ;;  %v445_v16 = vld [vmem:[%s1723_s19 + $0x780] sm:$0xff] }
 0x108   : > { %1209 = vst [vmem:[%s1745_s20 + $0x760] sm:$0xff] %v953_v6  ;;  %v956_v15 = vsub.f32 %v444_v12, %v700_v13  ;;  %v701_v17 = vld [vmem:[%s1730_s29 + $0x780] sm:$0xff]  ;;  %v446_v18 = vld [vmem:[%s1723_s19 + $0x788] sm:$0xff]  ;;  %v447_v21 = vld [vmem:[%s1723_s19 + $0x790] sm:$0xff] }
 0x109   : > { %1210 = vst [vmem:[%s1745_s20 + $0x768] sm:$0xff] %v954_v10  ;;  %v957_v19 = vsub.f32 %v445_v16, %v701_v17  ;;  %v702_v20 = vld [vmem:[%s1730_s29 + $0x788] sm:$0xff]  ;;  %v703_v22 = vld [vmem:[%s1730_s29 + $0x790] sm:$0xff]  ;;  %1211 = vst [vmem:[%s1745_s20 + $0x770] sm:$0xff] %v955_v14 }
 0x10a   : > { %1212 = vst [vmem:[%s1745_s20 + $0x778] sm:$0xff] %v956_v15  ;;  %v958_v23 = vsub.f32 %v446_v18, %v702_v20  ;;  %v959_v24 = vsub.f32 %v447_v21, %v703_v22  ;;  %v448_v25 = vld [vmem:[%s1723_s19 + $0x798] sm:$0xff]  ;;  %v449_v27 = vld [vmem:[%s1723_s19 + $0x7a0] sm:$0xff]  ;;  %v450_v30 = vld [vmem:[%s1723_s19 + $0x7a8] sm:$0xff] }
 0x10b   : > { %v704_v26 = vld [vmem:[%s1730_s29 + $0x798] sm:$0xff]  ;;  %1213 = vst [vmem:[%s1745_s20 + $0x780] sm:$0xff] %v957_v19  ;;  %v705_v29 = vld [vmem:[%s1730_s29 + $0x7a0] sm:$0xff]  ;;  %v706_v31 = vld [vmem:[%s1730_s29 + $0x7a8] sm:$0xff] }
 0x10c   : > { %v960_v28 = vsub.f32 %v448_v25, %v704_v26  ;;  %1214 = vst [vmem:[%s1745_s20 + $0x788] sm:$0xff] %v958_v23  ;;  %1215 = vst [vmem:[%s1745_s20 + $0x790] sm:$0xff] %v959_v24  ;;  %v961_v32 = vsub.f32 %v449_v27, %v705_v29  ;;  %v962_v33 = vsub.f32 %v450_v30, %v706_v31  ;;  %v451_v34 = vld [vmem:[%s1723_s19 + $0x7b0] sm:$0xff]  ;;  %v452_v36 = vld [vmem:[%s1723_s19 + $0x7b8] sm:$0xff] }
 0x10d   : > { %v707_v35 = vld [vmem:[%s1730_s29 + $0x7b0] sm:$0xff]  ;;  %v708_v38 = vld [vmem:[%s1730_s29 + $0x7b8] sm:$0xff]  ;;  %v453_v39 = vld [vmem:[%s1723_s19 + $0x7c0] sm:$0xff] }
 0x10e   : > { %1216 = vst [vmem:[%s1745_s20 + $0x798] sm:$0xff] %v960_v28  ;;  %v963_v37 = vsub.f32 %v451_v34, %v707_v35  ;;  %v709_v40 = vld [vmem:[%s1730_s29 + $0x7c0] sm:$0xff]  ;;  %1217 = vst [vmem:[%s1745_s20 + $0x7a0] sm:$0xff] %v961_v32  ;;  %v964_v41 = vsub.f32 %v452_v36, %v708_v38  ;;  %v454_v43 = vld [vmem:[%s1723_s19 + $0x7c8] sm:$0xff] }
 0x10f   : > { %1218 = vst [vmem:[%s1745_s20 + $0x7a8] sm:$0xff] %v962_v33  ;;  %v965_v42 = vsub.f32 %v453_v39, %v709_v40  ;;  %v710_v44 = vld [vmem:[%s1730_s29 + $0x7c8] sm:$0xff]  ;;  %v455_v45 = vld [vmem:[%s1723_s19 + $0x7d0] sm:$0xff]  ;;  %v456_v48 = vld [vmem:[%s1723_s19 + $0x7d8] sm:$0xff] }
 0x110   : > { %1219 = vst [vmem:[%s1745_s20 + $0x7b0] sm:$0xff] %v963_v37  ;;  %v966_v46 = vsub.f32 %v454_v43, %v710_v44  ;;  %v711_v47 = vld [vmem:[%s1730_s29 + $0x7d0] sm:$0xff]  ;;  %v712_v49 = vld [vmem:[%s1730_s29 + $0x7d8] sm:$0xff]  ;;  %1220 = vst [vmem:[%s1745_s20 + $0x7b8] sm:$0xff] %v964_v41 }
 0x111   : > { %1221 = vst [vmem:[%s1745_s20 + $0x7c0] sm:$0xff] %v965_v42  ;;  %v967_v50 = vsub.f32 %v455_v45, %v711_v47  ;;  %v968_v51 = vsub.f32 %v456_v48, %v712_v49  ;;  %v457_v52 = vld [vmem:[%s1723_s19 + $0x7e0] sm:$0xff]  ;;  %v458_v54 = vld [vmem:[%s1723_s19 + $0x7e8] sm:$0xff]  ;;  %v459_v57 = vld [vmem:[%s1723_s19 + $0x7f0] sm:$0xff] }
 0x112   : > { %v713_v53 = vld [vmem:[%s1730_s29 + $0x7e0] sm:$0xff]  ;;  %1222 = vst [vmem:[%s1745_s20 + $0x7c8] sm:$0xff] %v966_v46  ;;  %v714_v56 = vld [vmem:[%s1730_s29 + $0x7e8] sm:$0xff]  ;;  %v715_v58 = vld [vmem:[%s1730_s29 + $0x7f0] sm:$0xff] }
 0x113   : > { %v969_v55 = vsub.f32 %v457_v52, %v713_v53  ;;  %1223 = vst [vmem:[%s1745_s20 + $0x7d0] sm:$0xff] %v967_v50  ;;  %1224 = vst [vmem:[%s1745_s20 + $0x7d8] sm:$0xff] %v968_v51  ;;  %v970_v59 = vsub.f32 %v458_v54, %v714_v56  ;;  %v971_v60 = vsub.f32 %v459_v57, %v715_v58  ;;  %v460_v61 = vld [vmem:[%s1723_s19 + $0x7f8] sm:$0xff] }
 0x114   : > { %v716_v62 = vld [vmem:[%s1730_s29 + $0x7f8] sm:$0xff] }
 0x115   : > { %1225 = vst [vmem:[%s1745_s20 + $0x7e0] sm:$0xff] %v969_v55  ;;  %v972_v63 = vsub.f32 %v460_v61, %v716_v62  ;;  %1226 = vst [vmem:[%s1745_s20 + $0x7e8] sm:$0xff] %v970_v59 }
 0x116   : > { %1227 = vst [vmem:[%s1745_s20 + $0x7f0] sm:$0xff] %v971_v60 }
 0x117   : > { %1228 = vst [vmem:[%s1745_s20 + $0x7f8] sm:$0xff] %v972_v63 }
 0x118   : > { %1484 = shalt.err (!%p1481_p4)
}
 0x119   : > { %s1485_s25 = scalar_lea.hbm %s2507_s17, 32768  ;;  %s1489_s30 = scalar_lea.hbm %s2558_s2, 65536 }
 0x11a   : > { %p1486_p9 = scmp.ne.s32.totalorder %s2507_s17, %s1485_s25  ;;  %p1490_p5 = scmp.lt.s32.totalorder %s2507_s17, %s2558_s2 }
 0x11b   : > { %p1491_p8 = scmp.lt.s32.totalorder %s1489_s30, %s1485_s25 }
 0x11c   : > { %p1487_p11 = pnand %p1486_p9, %p2568_p1 }
 0x11d   : > { %p1492_p6 = por %p1491_p8, %p1490_p5 }
 0x11e   : > { %p1488_p3 = pneg %p1487_p11 }
 0x120   : > { %p1493_p13 = pnand %p1492_p6, %p1488_p3 }
 0x122   : > { %1496 = shalt.err (!%p1493_p13)
}
 0x123   : > { %s1546_s3 = smov 128   ;;  %s1547_s29 = smov 8  }
 0x124   : > { %1364 = dma.vmem_to_hbm [thread:$0]  (%p2568_p1), %s2509_s6, 32768, %s2507_s17, %s1230_s28, %s1546_s3, %s1546_s3, %s1547_s29  }
 0x125 PF: > { %s1258_s20 = sand.u32 1, %s1527_s9   ;;  %p2569_p12 = scmp.ne.s32.totalorder %s2564_s22, 0 }
 0x126   : > { %p2570_p7 = scmp.ge.s32.totalorder %s1539_s12, 2  ;;  %s1259_s5 = scalar_lea.sflag [#allocation4], %s1258_s20 }
 0x128   : > { %p1374_p10 = pnand %p2570_p7, %p2569_p12 }
 0x12a   : > { %p1375_p0 = pneg %p1374_p10 }
 0x12c   : > { %1522 = dma.done.wait (%p1375_p0), %s1259_s5, 32768  }
 0x12d   : > { %1524 = vsyncadd (%p1375_p0), %s1259_s5, 4294934528  ;;  %p18_p2 = scmp.ge.s32.totalorder %s1588_s15, 4   ;;  %s2571_s9 = smov %s1531_s10 }
 0x12e   : > { %s2572_s10 = smov %s1535_s11  ;;  %s2573_s11 = smov %s1600_s18 }
 0x12f   : > { %s2574_s12 = smov %s1588_s15  ;;  %20 = sbr.rel (!%p18_p2) target bundleno = 7 (0x7), region = 86 }
 0x134   :  { %1264 = vsyncpa [#allocation3], 1 }
 0x135   :  { %1266 = vsyncpa [#allocation3 + $0x1], 1 }
 0x136   :  { %1267 = vsyncpa [#allocation6], 1 }
 0x137   :  { %1269 = vsyncpa [#allocation6 + $0x1], 1 }
 0x138   :  { %1270 = vsyncpa [#allocation4], 1 }
 0x139   :  { %1272 = vsyncpa [#allocation4 + $0x1], 1 }

</bundles_post_ra>
